<compile_context>
chip_gen: v7x
topology: tpu7x:2x2x1
jax: 0.10.0
libtpu: 0.0.40
codegen_flags: <defaults>
</compile_context>

<pallas_src>
import jax
import jax.numpy as jnp
from jax.experimental import pallas as pl
from jax.experimental.pallas import tpu as pltpu


# ---------------------------------------------------------------------------
# Fused Bottleneck kernel
# ---------------------------------------------------------------------------
def _bottleneck_kernel(x_ref, w1_ref, s1_ref, w2_ref, s2_ref, w3_ref, s3_ref, o_ref):
    """One (batch, row-tile) grid step of the fused bottleneck.

    x_ref : (1, H+2, Wp, C)  f32   zero-padded NHWC input (Wp >= W+2, mult of 8)
    w1_ref: (C,  P1)         bf16  conv1 weight, BN1 scale folded in
    w2_ref: (9, P1, P2)      bf16  conv2 taps (kh*3+kw), BN2 scale folded in
    w3_ref: (P2, C)          bf16  conv3 weight, BN3 scale folded in
    s*_ref: (1, P)           f32   folded BN shifts (bias+BN)
    o_ref : (1, TH, W, C)    f32   output tile
    """
    TH = o_ref.shape[1]
    W = o_ref.shape[2]
    Co = o_ref.shape[3]
    Hp = x_ref.shape[1]          # H + 2
    Wp = x_ref.shape[2]
    C = x_ref.shape[3]
    P1 = w1_ref.shape[1]
    P2 = w3_ref.shape[0]
    H = Hp - 2

    h = pl.program_id(1)
    row0 = pl.multiple_of(h * TH, TH)          # first padded-image row of the slab

    # Halo'd input slab (TH+2 rows): conv1 input + residual source.
    xt = x_ref[0, pl.ds(row0, TH + 2), :, :]                 # (TH+2, Wp, C) f32
    xt_b = xt.astype(jnp.bfloat16)

    # ---- conv1 (1x1) + BN1 + ReLU on the halo'd slab ----------------------
    a1 = jnp.dot(xt_b.reshape((TH + 2) * Wp, C), w1_ref[...],
                 preferred_element_type=jnp.float32)
    a1 = jnp.maximum(a1 + s1_ref[...], 0.0).reshape(TH + 2, Wp, P1)

    # conv2's zero padding applies to conv1's *output*: zero the pad ring
    # (pad positions would otherwise carry relu(shift1)).
    rows = row0 + jax.lax.broadcasted_iota(jnp.int32, (TH + 2, Wp, P1), 0)
    cols = jax.lax.broadcasted_iota(jnp.int32, (TH + 2, Wp, P1), 1)
    valid = (rows >= 1) & (rows <= H) & (cols >= 1) & (cols <= W)
    a1 = jnp.where(valid, a1, 0.0).astype(jnp.bfloat16)

    # ---- conv2 (3x3, stride 1, pad 1) + BN2 + ReLU: 9 shifted matmuls ------
    acc = jnp.zeros((TH * W, P2), jnp.float32)
    for kh in range(3):
        for kw in range(3):
            patch = a1[kh:kh + TH, kw:kw + W, :].reshape(TH * W, P1)
            acc = acc + jnp.dot(patch, w2_ref[kh * 3 + kw],
                                preferred_element_type=jnp.float32)
    a2 = jnp.maximum(acc + s2_ref[...], 0.0).astype(jnp.bfloat16)

    # ---- conv3 (1x1) + BN3 + residual + ReLU -------------------------------
    y = jnp.dot(a2, w3_ref[...], preferred_element_type=jnp.float32) + s3_ref[...]
    res = xt[1:TH + 1, 1:W + 1, :].reshape(TH * W, Co)       # f32 identity tile
    out = jnp.maximum(y + res, 0.0)
    o_ref[...] = out.reshape(1, TH, W, Co).astype(o_ref.dtype)


# ---------------------------------------------------------------------------
# Host-side helpers (BN folding, padding, tile selection)
# ---------------------------------------------------------------------------
def _round_up(x, m):
    return (x + m - 1) // m * m


def _pad_to(a, shape):
    pads = [(0, t - s) for s, t in zip(a.shape, shape)]
    return jnp.pad(a, pads)


def fold_bn(conv_bias, gamma, beta, mean, var, eps=1e-5):
    scale = gamma / jnp.sqrt(var + eps)
    shift = beta + scale * (conv_bias - mean)
    return scale, shift


def _pick_row_tile(H, step_bytes, budget_bytes):
    """Largest divisor of H whose per-grid-step working set fits the budget,
    preferring >=2 steps along H so output writeback overlaps compute."""
    divs = [d for d in range(H, 0, -1) if H % d == 0]
    prefer = [d for d in divs if d <= max(1, H // 2)] or [H]
    for th in prefer:
        if step_bytes(th) <= budget_bytes:
            return th
    return 1


# ---------------------------------------------------------------------------
# Forward pass (wrapper around the single fused pallas_call)
# ---------------------------------------------------------------------------
def bottleneck_forward(x_nchw, params, stride=1, eps=1e-5):
    # Guard: the reference module's residual add is only shape-valid when
    # downsample=None, i.e. stride=1 and inplanes == planes*expansion.
    assert stride == 1, "Pallas path supports stride=1 / downsample=None only"
    N, Cin, H, W = x_nchw.shape
    planes = params["w1"].shape[0]
    out_planes = params["w3"].shape[0]
    assert out_planes == Cin, "residual add requires inplanes == planes*expansion"

    f32, bf16 = jnp.float32, jnp.bfloat16
    LANE = 128
    C = _round_up(Cin, LANE)       # padded in/out channels (equal by the assert)
    P1 = _round_up(planes, LANE)
    P2 = P1
    Co = C

    # --- fold BN (inference stats) + conv bias; fold scales into weights ----
    s1, b1 = fold_bn(params["b1"], params["g1"], params["be1"],
                     params["m1"], params["v1"], eps)
    w1 = (params["w1"][:, :, 0, 0] * s1[:, None]).T              # (Cin, planes)
    w1 = _pad_to(w1, (C, P1)).astype(bf16)
    b1 = _pad_to(b1.reshape(1, -1), (1, P1)).astype(f32)

    s2, b2 = fold_bn(params["b2"], params["g2"], params["be2"],
                     params["m2"], params["v2"], eps)
    w2 = params["w2"] * s2[:, None, None, None]                  # OIHW
    w2 = jnp.transpose(w2, (2, 3, 1, 0))                         # (kh, kw, cin, cout)
    w2 = _pad_to(w2, (3, 3, P1, P2)).reshape(9, P1, P2).astype(bf16)
    b2 = _pad_to(b2.reshape(1, -1), (1, P2)).astype(f32)

    s3, b3 = fold_bn(params["b3"], params["g3"], params["be3"],
                     params["m3"], params["v3"], eps)
    w3 = (params["w3"][:, :, 0, 0] * s3[:, None]).T              # (planes, out_planes)
    w3 = _pad_to(w3, (P2, Co)).astype(bf16)
    b3 = _pad_to(b3.reshape(1, -1), (1, Co)).astype(f32)

    # --- NHWC, channels padded to 128 lanes, spatial zero-pad for the 3x3 ---
    x = jnp.transpose(x_nchw, (0, 2, 3, 1)).astype(f32)          # (N, H, W, Cin)
    Wp = _round_up(W + 2, 8)                                     # sublane-aligned
    xp = jnp.pad(x, ((0, 0), (1, 1), (1, Wp - W - 1), (0, C - Cin)))

    # --- pick the H row-tile so the per-step working set fits VMEM ----------
    def step_bytes(th):
        slab = (th + 2) * Wp * C * 4                 # f32 input slab
        a1b = (th + 2) * Wp * P1 * (4 + 2)           # conv1 acts (f32 + bf16)
        body = th * W * (P2 * 4 + P2 * 2 + Co * 4)   # conv2 acc + a2 + conv3 out
        io = 2 * ((H + 2) * Wp * C * 4 + th * W * Co * 4)  # double-buffered blocks
        wts = (C * P1 + 9 * P1 * P2 + P2 * Co) * 2
        return slab + a1b + body + io + wts

    TH = _pick_row_tile(H, step_bytes, budget_bytes=24 * 1024 * 1024)
    nH = H // TH

    flops = 2 * N * H * W * (C * P1 + 9 * P1 * P2 + P2 * Co)
    bytes_accessed = (xp.size * 4 + w1.size * 2 + w2.size * 2 + w3.size * 2
                      + (b1.size + b2.size + b3.size) * 4 + N * H * W * Co * 4)

    out = pl.pallas_call(
        _bottleneck_kernel,
        out_shape=jax.ShapeDtypeStruct((N, H, W, Co), f32),
        grid_spec=pltpu.PrefetchScalarGridSpec(
            num_scalar_prefetch=0,
            grid=(N, nH),
            in_specs=[
                # whole padded image of batch n: resident across the H axis
                pl.BlockSpec((1, H + 2, Wp, C), lambda n, h: (n, 0, 0, 0)),
                # weights / shifts: resident for the whole call
                pl.BlockSpec((C, P1), lambda n, h: (0, 0)),
                pl.BlockSpec((1, P1), lambda n, h: (0, 0)),
                pl.BlockSpec((9, P1, P2), lambda n, h: (0, 0, 0)),
                pl.BlockSpec((1, P2), lambda n, h: (0, 0)),
                pl.BlockSpec((P2, Co), lambda n, h: (0, 0)),
                pl.BlockSpec((1, Co), lambda n, h: (0, 0)),
            ],
            out_specs=pl.BlockSpec((1, TH, W, Co), lambda n, h: (n, h, 0, 0)),
        ),
        compiler_params=pltpu.CompilerParams(
            dimension_semantics=("parallel", "parallel"),
            vmem_limit_bytes=32 * 1024 * 1024,
        ),
        cost_estimate=pl.CostEstimate(
            flops=int(flops), transcendentals=0, bytes_accessed=int(bytes_accessed)),
    )(xp, w1, b1, w2, b2, w3, b3)

    out = out[..., :out_planes]                                  # drop channel pad
    return jnp.transpose(out, (0, 3, 1, 2))                      # back to NCHW


# ---------------------------------------------------------------------------
# Plain-JAX reference (for correctness check)
# ---------------------------------------------------------------------------
def _ref_conv(x_nchw, w, b, stride=1, padding=0):
    out = jax.lax.conv_general_dilated(
        x_nchw, w, window_strides=(stride, stride),
        padding=((padding, padding), (padding, padding)),
        dimension_numbers=("NCHW", "OIHW", "NCHW"))
    return out + b[None, :, None, None]


def _ref_bn(x_nchw, gamma, beta, mean, var, eps=1e-5):
    inv = gamma / jnp.sqrt(var + eps)
    return (x_nchw - mean[None, :, None, None]) * inv[None, :, None, None] \
        + beta[None, :, None, None]


def bottleneck_reference(x, p, stride=1):
    out = jax.nn.relu(_ref_bn(_ref_conv(x, p["w1"], p["b1"]), p["g1"], p["be1"],
                              p["m1"], p["v1"]))
    out = jax.nn.relu(_ref_bn(_ref_conv(out, p["w2"], p["b2"], stride=stride,
                                        padding=1),
                              p["g2"], p["be2"], p["m2"], p["v2"]))
    out = _ref_bn(_ref_conv(out, p["w3"], p["b3"]), p["g3"], p["be3"],
                  p["m3"], p["v3"])
    return jax.nn.relu(out + x)


# ---------------------------------------------------------------------------
# Main
# ---------------------------------------------------------------------------
if __name__ == "__main__":
    # Bottleneck(inplanes=16, planes=4): expansion=4 -> out channels 16 == inplanes,
    # so downsample=None / stride=1 is the valid configuration.
    N, inplanes, planes, HW, stride = 2, 16, 4, 16, 1
    expansion = 4
    out_planes = planes * expansion                              # == inplanes

    key = jax.random.PRNGKey(0)
    ks = jax.random.split(key, 16)

    def rn(k, shape, scl=0.1):
        return (scl * jax.random.normal(k, shape)).astype(jnp.float32)

    params = {
        # conv1: 1x1, inplanes -> planes, bias=True
        "w1": rn(ks[0], (planes, inplanes, 1, 1)),
        "b1": rn(ks[1], (planes,)),
        "g1": 1.0 + rn(ks[2], (planes,)),
        "be1": rn(ks[3], (planes,)),
        "m1": rn(ks[4], (planes,)),
        "v1": 1.0 + jnp.abs(rn(ks[5], (planes,))),
        # conv2: 3x3, planes -> planes, stride=1, padding=1, bias=True
        "w2": rn(ks[6], (planes, planes, 3, 3)),
        "b2": rn(ks[7], (planes,)),
        "g2": 1.0 + rn(ks[8], (planes,)),
        "be2": rn(ks[9], (planes,)),
        "m2": rn(ks[10], (planes,)),
        "v2": 1.0 + jnp.abs(rn(ks[11], (planes,))),
        # conv3: 1x1, planes -> planes*4, bias=True
        "w3": rn(ks[12], (out_planes, planes, 1, 1)),
        "b3": rn(ks[13], (out_planes,)),
        "g3": 1.0 + rn(ks[14], (out_planes,)),
        "be3": rn(ks[15], (out_planes,)),
        "m3": rn(jax.random.PRNGKey(101), (out_planes,)),
        "v3": 1.0 + jnp.abs(rn(jax.random.PRNGKey(102), (out_planes,))),
    }

    x = rn(jax.random.PRNGKey(7), (N, inplanes, HW, HW), scl=1.0)   # NCHW input

    out = bottleneck_forward(x, params, stride=stride)
    out = jax.block_until_ready(out)

    ref = jax.block_until_ready(bottleneck_reference(x, params, stride=stride))
    assert out.shape == ref.shape == (N, out_planes, HW, HW)
    # bf16 MXU inputs -> compare with bf16-appropriate tolerances.
    assert jnp.allclose(out, ref, rtol=2e-2, atol=2e-2), "mismatch vs reference"

    print("KERNEL_OK")
</pallas_src>

<mosaic_0001>
module attributes {stable_mosaic.version = 11 : i64} {
  func.func @_bottleneck_kernel(%arg0: i32, %arg1: i32, %arg2: memref<1x18x24x128xf32, #tpu.memory_space<vmem>>, %arg3: memref<128x128xbf16, #tpu.memory_space<vmem>>, %arg4: memref<1x128xf32, #tpu.memory_space<vmem>>, %arg5: memref<9x128x128xbf16, #tpu.memory_space<vmem>>, %arg6: memref<1x128xf32, #tpu.memory_space<vmem>>, %arg7: memref<128x128xbf16, #tpu.memory_space<vmem>>, %arg8: memref<1x128xf32, #tpu.memory_space<vmem>>, %arg9: memref<1x8x16x128xf32, #tpu.memory_space<vmem>>) attributes {dimension_semantics = [#tpu.dimension_semantics<parallel>, #tpu.dimension_semantics<parallel>], iteration_bounds = array<i64: 2, 2>, scalar_prefetch = 0 : i64, scratch_operands = 0 : i64, tpu.core_type = #tpu.core_type<tc>, window_params = [{transform_indices = @transform_0, window_bounds = array<i64: 1, 18, 24, 128>}, {pipeline_mode = #tpu.pipeline_mode<synchronous>, transform_indices = @transform_1, window_bounds = array<i64: 128, 128>}, {pipeline_mode = #tpu.pipeline_mode<synchronous>, transform_indices = @transform_2, window_bounds = array<i64: 1, 128>}, {pipeline_mode = #tpu.pipeline_mode<synchronous>, transform_indices = @transform_3, window_bounds = array<i64: 9, 128, 128>}, {pipeline_mode = #tpu.pipeline_mode<synchronous>, transform_indices = @transform_4, window_bounds = array<i64: 1, 128>}, {pipeline_mode = #tpu.pipeline_mode<synchronous>, transform_indices = @transform_5, window_bounds = array<i64: 128, 128>}, {pipeline_mode = #tpu.pipeline_mode<synchronous>, transform_indices = @transform_6, window_bounds = array<i64: 1, 128>}, {transform_indices = @transform_7, window_bounds = array<i64: 1, 8, 16, 128>}]} {
    %c8_i32 = arith.constant 8 : i32
    %0 = arith.muli %arg1, %c8_i32 : i32
    %1 = tpu.assume_multiple %0, 8 : i32
    %c0 = arith.constant 0 : index
    %2 = arith.index_cast %1 : i32 to index
    %c0_0 = arith.constant 0 : index
    %c0_1 = arith.constant 0 : index
    %3 = vector.load %arg2[%c0, %2, %c0_0, %c0_1] : memref<1x18x24x128xf32, #tpu.memory_space<vmem>>, vector<1x10x24x128xf32>
    %4 = vector.shape_cast %3 : vector<1x10x24x128xf32> to vector<10x24x128xf32>
    %5 = arith.truncf %4 : vector<10x24x128xf32> to vector<10x24x128xbf16>
    %6 = vector.shape_cast %5 : vector<10x24x128xbf16> to vector<240x128xbf16>
    %c0_2 = arith.constant 0 : index
    %c0_3 = arith.constant 0 : index
    %7 = vector.load %arg3[%c0_2, %c0_3] : memref<128x128xbf16, #tpu.memory_space<vmem>>, vector<128x128xbf16>
    %cst = arith.constant dense<0.000000e+00> : vector<240x128xf32>
    %8 = tpu.matmul %6, %7, %cst {dimension_numbers = #tpu.dot_dimension_numbers<[1], [0], [0], [1], [0, 0, 1, 1], [], []>} : vector<240x128xbf16>, vector<128x128xbf16>, vector<240x128xf32> -> vector<240x128xf32>
    %c0_4 = arith.constant 0 : index
    %c0_5 = arith.constant 0 : index
    %9 = vector.load %arg4[%c0_4, %c0_5] : memref<1x128xf32, #tpu.memory_space<vmem>>, vector<1x128xf32>
    %10 = vector.broadcast %9 : vector<1x128xf32> to vector<240x128xf32>
    %11 = arith.addf %8, %10 : vector<240x128xf32>
    %cst_6 = arith.constant 0.000000e+00 : f32
    %12 = vector.broadcast %cst_6 : f32 to vector<240x128xf32>
    %13 = arith.maximumf %11, %12 : vector<240x128xf32>
    %14 = vector.shape_cast %13 : vector<240x128xf32> to vector<10x24x128xf32>
    %15 = tpu.iota {dimensions = array<i32: 0>} : vector<10x24x128xi32>
    %16 = vector.broadcast %1 : i32 to vector<10x24x128xi32>
    %17 = arith.addi %16, %15 : vector<10x24x128xi32>
    %18 = tpu.iota {dimensions = array<i32: 1>} : vector<10x24x128xi32>
    %c1_i32 = arith.constant 1 : i32
    %19 = vector.broadcast %c1_i32 : i32 to vector<10x24x128xi32>
    %20 = arith.cmpi sge, %17, %19 : vector<10x24x128xi32>
    %c16_i32 = arith.constant 16 : i32
    %21 = vector.broadcast %c16_i32 : i32 to vector<10x24x128xi32>
    %22 = arith.cmpi sle, %17, %21 : vector<10x24x128xi32>
    %23 = arith.andi %20, %22 : vector<10x24x128xi1>
    %c1_i32_7 = arith.constant 1 : i32
    %24 = vector.broadcast %c1_i32_7 : i32 to vector<10x24x128xi32>
    %25 = arith.cmpi sge, %18, %24 : vector<10x24x128xi32>
    %26 = arith.andi %23, %25 : vector<10x24x128xi1>
    %c16_i32_8 = arith.constant 16 : i32
    %27 = vector.broadcast %c16_i32_8 : i32 to vector<10x24x128xi32>
    %28 = arith.cmpi sle, %18, %27 : vector<10x24x128xi32>
    %29 = arith.andi %26, %28 : vector<10x24x128xi1>
    %cst_9 = arith.constant 0.000000e+00 : f32
    %30 = vector.broadcast %cst_9 : f32 to vector<10x24x128xf32>
    %31 = arith.select %29, %14, %30 : vector<10x24x128xi1>, vector<10x24x128xf32>
    %32 = arith.truncf %31 : vector<10x24x128xf32> to vector<10x24x128xbf16>
    %cst_10 = arith.constant 0.000000e+00 : f32
    %33 = vector.broadcast %cst_10 : f32 to vector<128x128xf32>
    %34 = vector.extract_strided_slice %32 {offsets = [0, 0, 0], sizes = [8, 16, 128], strides = [1, 1, 1]} : vector<10x24x128xbf16> to vector<8x16x128xbf16>
    %35 = vector.shape_cast %34 : vector<8x16x128xbf16> to vector<128x128xbf16>
    %c0_11 = arith.constant 0 : index
    %c0_12 = arith.constant 0 : index
    %c0_13 = arith.constant 0 : index
    %36 = vector.load %arg5[%c0_11, %c0_12, %c0_13] : memref<9x128x128xbf16, #tpu.memory_space<vmem>>, vector<1x128x128xbf16>
    %37 = vector.shape_cast %36 : vector<1x128x128xbf16> to vector<128x128xbf16>
    %cst_14 = arith.constant dense<0.000000e+00> : vector<128x128xf32>
    %38 = tpu.matmul %35, %37, %cst_14 {dimension_numbers = #tpu.dot_dimension_numbers<[1], [0], [0], [1], [0, 0, 1, 1], [], []>} : vector<128x128xbf16>, vector<128x128xbf16>, vector<128x128xf32> -> vector<128x128xf32>
    %39 = arith.addf %33, %38 : vector<128x128xf32>
    %40 = vector.extract_strided_slice %32 {offsets = [0, 1, 0], sizes = [8, 16, 128], strides = [1, 1, 1]} : vector<10x24x128xbf16> to vector<8x16x128xbf16>
    %41 = vector.shape_cast %40 : vector<8x16x128xbf16> to vector<128x128xbf16>
    %c1 = arith.constant 1 : index
    %c0_15 = arith.constant 0 : index
    %c0_16 = arith.constant 0 : index
    %42 = vector.load %arg5[%c1, %c0_15, %c0_16] : memref<9x128x128xbf16, #tpu.memory_space<vmem>>, vector<1x128x128xbf16>
    %43 = vector.shape_cast %42 : vector<1x128x128xbf16> to vector<128x128xbf16>
    %cst_17 = arith.constant dense<0.000000e+00> : vector<128x128xf32>
    %44 = tpu.matmul %41, %43, %cst_17 {dimension_numbers = #tpu.dot_dimension_numbers<[1], [0], [0], [1], [0, 0, 1, 1], [], []>} : vector<128x128xbf16>, vector<128x128xbf16>, vector<128x128xf32> -> vector<128x128xf32>
    %45 = arith.addf %39, %44 : vector<128x128xf32>
    %46 = vector.extract_strided_slice %32 {offsets = [0, 2, 0], sizes = [8, 16, 128], strides = [1, 1, 1]} : vector<10x24x128xbf16> to vector<8x16x128xbf16>
    %47 = vector.shape_cast %46 : vector<8x16x128xbf16> to vector<128x128xbf16>
    %c2 = arith.constant 2 : index
    %c0_18 = arith.constant 0 : index
    %c0_19 = arith.constant 0 : index
    %48 = vector.load %arg5[%c2, %c0_18, %c0_19] : memref<9x128x128xbf16, #tpu.memory_space<vmem>>, vector<1x128x128xbf16>
    %49 = vector.shape_cast %48 : vector<1x128x128xbf16> to vector<128x128xbf16>
    %cst_20 = arith.constant dense<0.000000e+00> : vector<128x128xf32>
    %50 = tpu.matmul %47, %49, %cst_20 {dimension_numbers = #tpu.dot_dimension_numbers<[1], [0], [0], [1], [0, 0, 1, 1], [], []>} : vector<128x128xbf16>, vector<128x128xbf16>, vector<128x128xf32> -> vector<128x128xf32>
    %51 = arith.addf %45, %50 : vector<128x128xf32>
    %52 = vector.extract_strided_slice %32 {offsets = [1, 0, 0], sizes = [8, 16, 128], strides = [1, 1, 1]} : vector<10x24x128xbf16> to vector<8x16x128xbf16>
    %53 = vector.shape_cast %52 : vector<8x16x128xbf16> to vector<128x128xbf16>
    %c3 = arith.constant 3 : index
    %c0_21 = arith.constant 0 : index
    %c0_22 = arith.constant 0 : index
    %54 = vector.load %arg5[%c3, %c0_21, %c0_22] : memref<9x128x128xbf16, #tpu.memory_space<vmem>>, vector<1x128x128xbf16>
    %55 = vector.shape_cast %54 : vector<1x128x128xbf16> to vector<128x128xbf16>
    %cst_23 = arith.constant dense<0.000000e+00> : vector<128x128xf32>
    %56 = tpu.matmul %53, %55, %cst_23 {dimension_numbers = #tpu.dot_dimension_numbers<[1], [0], [0], [1], [0, 0, 1, 1], [], []>} : vector<128x128xbf16>, vector<128x128xbf16>, vector<128x128xf32> -> vector<128x128xf32>
    %57 = arith.addf %51, %56 : vector<128x128xf32>
    %58 = vector.extract_strided_slice %32 {offsets = [1, 1, 0], sizes = [8, 16, 128], strides = [1, 1, 1]} : vector<10x24x128xbf16> to vector<8x16x128xbf16>
    %59 = vector.shape_cast %58 : vector<8x16x128xbf16> to vector<128x128xbf16>
    %c4 = arith.constant 4 : index
    %c0_24 = arith.constant 0 : index
    %c0_25 = arith.constant 0 : index
    %60 = vector.load %arg5[%c4, %c0_24, %c0_25] : memref<9x128x128xbf16, #tpu.memory_space<vmem>>, vector<1x128x128xbf16>
    %61 = vector.shape_cast %60 : vector<1x128x128xbf16> to vector<128x128xbf16>
    %cst_26 = arith.constant dense<0.000000e+00> : vector<128x128xf32>
    %62 = tpu.matmul %59, %61, %cst_26 {dimension_numbers = #tpu.dot_dimension_numbers<[1], [0], [0], [1], [0, 0, 1, 1], [], []>} : vector<128x128xbf16>, vector<128x128xbf16>, vector<128x128xf32> -> vector<128x128xf32>
    %63 = arith.addf %57, %62 : vector<128x128xf32>
    %64 = vector.extract_strided_slice %32 {offsets = [1, 2, 0], sizes = [8, 16, 128], strides = [1, 1, 1]} : vector<10x24x128xbf16> to vector<8x16x128xbf16>
    %65 = vector.shape_cast %64 : vector<8x16x128xbf16> to vector<128x128xbf16>
    %c5 = arith.constant 5 : index
    %c0_27 = arith.constant 0 : index
    %c0_28 = arith.constant 0 : index
    %66 = vector.load %arg5[%c5, %c0_27, %c0_28] : memref<9x128x128xbf16, #tpu.memory_space<vmem>>, vector<1x128x128xbf16>
    %67 = vector.shape_cast %66 : vector<1x128x128xbf16> to vector<128x128xbf16>
    %cst_29 = arith.constant dense<0.000000e+00> : vector<128x128xf32>
    %68 = tpu.matmul %65, %67, %cst_29 {dimension_numbers = #tpu.dot_dimension_numbers<[1], [0], [0], [1], [0, 0, 1, 1], [], []>} : vector<128x128xbf16>, vector<128x128xbf16>, vector<128x128xf32> -> vector<128x128xf32>
    %69 = arith.addf %63, %68 : vector<128x128xf32>
    %70 = vector.extract_strided_slice %32 {offsets = [2, 0, 0], sizes = [8, 16, 128], strides = [1, 1, 1]} : vector<10x24x128xbf16> to vector<8x16x128xbf16>
    %71 = vector.shape_cast %70 : vector<8x16x128xbf16> to vector<128x128xbf16>
    %c6 = arith.constant 6 : index
    %c0_30 = arith.constant 0 : index
    %c0_31 = arith.constant 0 : index
    %72 = vector.load %arg5[%c6, %c0_30, %c0_31] : memref<9x128x128xbf16, #tpu.memory_space<vmem>>, vector<1x128x128xbf16>
    %73 = vector.shape_cast %72 : vector<1x128x128xbf16> to vector<128x128xbf16>
    %cst_32 = arith.constant dense<0.000000e+00> : vector<128x128xf32>
    %74 = tpu.matmul %71, %73, %cst_32 {dimension_numbers = #tpu.dot_dimension_numbers<[1], [0], [0], [1], [0, 0, 1, 1], [], []>} : vector<128x128xbf16>, vector<128x128xbf16>, vector<128x128xf32> -> vector<128x128xf32>
    %75 = arith.addf %69, %74 : vector<128x128xf32>
    %76 = vector.extract_strided_slice %32 {offsets = [2, 1, 0], sizes = [8, 16, 128], strides = [1, 1, 1]} : vector<10x24x128xbf16> to vector<8x16x128xbf16>
    %77 = vector.shape_cast %76 : vector<8x16x128xbf16> to vector<128x128xbf16>
    %c7 = arith.constant 7 : index
    %c0_33 = arith.constant 0 : index
    %c0_34 = arith.constant 0 : index
    %78 = vector.load %arg5[%c7, %c0_33, %c0_34] : memref<9x128x128xbf16, #tpu.memory_space<vmem>>, vector<1x128x128xbf16>
    %79 = vector.shape_cast %78 : vector<1x128x128xbf16> to vector<128x128xbf16>
    %cst_35 = arith.constant dense<0.000000e+00> : vector<128x128xf32>
    %80 = tpu.matmul %77, %79, %cst_35 {dimension_numbers = #tpu.dot_dimension_numbers<[1], [0], [0], [1], [0, 0, 1, 1], [], []>} : vector<128x128xbf16>, vector<128x128xbf16>, vector<128x128xf32> -> vector<128x128xf32>
    %81 = arith.addf %75, %80 : vector<128x128xf32>
    %82 = vector.extract_strided_slice %32 {offsets = [2, 2, 0], sizes = [8, 16, 128], strides = [1, 1, 1]} : vector<10x24x128xbf16> to vector<8x16x128xbf16>
    %83 = vector.shape_cast %82 : vector<8x16x128xbf16> to vector<128x128xbf16>
    %c8 = arith.constant 8 : index
    %c0_36 = arith.constant 0 : index
    %c0_37 = arith.constant 0 : index
    %84 = vector.load %arg5[%c8, %c0_36, %c0_37] : memref<9x128x128xbf16, #tpu.memory_space<vmem>>, vector<1x128x128xbf16>
    %85 = vector.shape_cast %84 : vector<1x128x128xbf16> to vector<128x128xbf16>
    %cst_38 = arith.constant dense<0.000000e+00> : vector<128x128xf32>
    %86 = tpu.matmul %83, %85, %cst_38 {dimension_numbers = #tpu.dot_dimension_numbers<[1], [0], [0], [1], [0, 0, 1, 1], [], []>} : vector<128x128xbf16>, vector<128x128xbf16>, vector<128x128xf32> -> vector<128x128xf32>
    %87 = arith.addf %81, %86 : vector<128x128xf32>
    %c0_39 = arith.constant 0 : index
    %c0_40 = arith.constant 0 : index
    %88 = vector.load %arg6[%c0_39, %c0_40] : memref<1x128xf32, #tpu.memory_space<vmem>>, vector<1x128xf32>
    %89 = vector.broadcast %88 : vector<1x128xf32> to vector<128x128xf32>
    %90 = arith.addf %87, %89 : vector<128x128xf32>
    %cst_41 = arith.constant 0.000000e+00 : f32
    %91 = vector.broadcast %cst_41 : f32 to vector<128x128xf32>
    %92 = arith.maximumf %90, %91 : vector<128x128xf32>
    %93 = arith.truncf %92 : vector<128x128xf32> to vector<128x128xbf16>
    %c0_42 = arith.constant 0 : index
    %c0_43 = arith.constant 0 : index
    %94 = vector.load %arg7[%c0_42, %c0_43] : memref<128x128xbf16, #tpu.memory_space<vmem>>, vector<128x128xbf16>
    %cst_44 = arith.constant dense<0.000000e+00> : vector<128x128xf32>
    %95 = tpu.matmul %93, %94, %cst_44 {dimension_numbers = #tpu.dot_dimension_numbers<[1], [0], [0], [1], [0, 0, 1, 1], [], []>} : vector<128x128xbf16>, vector<128x128xbf16>, vector<128x128xf32> -> vector<128x128xf32>
    %c0_45 = arith.constant 0 : index
    %c0_46 = arith.constant 0 : index
    %96 = vector.load %arg8[%c0_45, %c0_46] : memref<1x128xf32, #tpu.memory_space<vmem>>, vector<1x128xf32>
    %97 = vector.broadcast %96 : vector<1x128xf32> to vector<128x128xf32>
    %98 = arith.addf %95, %97 : vector<128x128xf32>
    %99 = vector.extract_strided_slice %4 {offsets = [1, 1, 0], sizes = [8, 16, 128], strides = [1, 1, 1]} : vector<10x24x128xf32> to vector<8x16x128xf32>
    %100 = vector.shape_cast %99 : vector<8x16x128xf32> to vector<128x128xf32>
    %101 = arith.addf %98, %100 : vector<128x128xf32>
    %cst_47 = arith.constant 0.000000e+00 : f32
    %102 = vector.broadcast %cst_47 : f32 to vector<128x128xf32>
    %103 = arith.maximumf %101, %102 : vector<128x128xf32>
    %104 = vector.shape_cast %103 : vector<128x128xf32> to vector<1x8x16x128xf32>
    %c0_48 = arith.constant 0 : index
    %c0_49 = arith.constant 0 : index
    %c0_50 = arith.constant 0 : index
    %c0_51 = arith.constant 0 : index
    %105 = vector.load %arg9[%c0_48, %c0_49, %c0_50, %c0_51] : memref<1x8x16x128xf32, #tpu.memory_space<vmem>>, vector<1x8x16x128xf32>
    tpu.vector_store %arg9[%c0_48, %c0_49, %c0_50, %c0_51], %104 {strides = array<i32>} : memref<1x8x16x128xf32, #tpu.memory_space<vmem>>, vector<1x8x16x128xf32>,
    return
  }
  func.func @transform_0(%arg0: i32, %arg1: i32) -> (i32, i32, i32, i32) {
    %c0_i32 = arith.constant 0 : i32
    %c0_i32_0 = arith.constant 0 : i32
    %c0_i32_1 = arith.constant 0 : i32
    %c0_i32_2 = arith.constant 0 : i32
    return %arg0, %c0_i32, %c0_i32_0, %c0_i32_1 : i32, i32, i32, i32
  }
  func.func @transform_1(%arg0: i32, %arg1: i32) -> (i32, i32) {
    %c0_i32 = arith.constant 0 : i32
    %c0_i32_0 = arith.constant 0 : i32
    %c0_i32_1 = arith.constant 0 : i32
    return %c0_i32, %c0_i32_0 : i32, i32
  }
  func.func @transform_2(%arg0: i32, %arg1: i32) -> (i32, i32) {
    %c0_i32 = arith.constant 0 : i32
    %c0_i32_0 = arith.constant 0 : i32
    %c0_i32_1 = arith.constant 0 : i32
    return %c0_i32, %c0_i32_0 : i32, i32
  }
  func.func @transform_3(%arg0: i32, %arg1: i32) -> (i32, i32, i32) {
    %c0_i32 = arith.constant 0 : i32
    %c0_i32_0 = arith.constant 0 : i32
    %c0_i32_1 = arith.constant 0 : i32
    %c0_i32_2 = arith.constant 0 : i32
    return %c0_i32, %c0_i32_0, %c0_i32_1 : i32, i32, i32
  }
  func.func @transform_4(%arg0: i32, %arg1: i32) -> (i32, i32) {
    %c0_i32 = arith.constant 0 : i32
    %c0_i32_0 = arith.constant 0 : i32
    %c0_i32_1 = arith.constant 0 : i32
    return %c0_i32, %c0_i32_0 : i32, i32
  }
  func.func @transform_5(%arg0: i32, %arg1: i32) -> (i32, i32) {
    %c0_i32 = arith.constant 0 : i32
    %c0_i32_0 = arith.constant 0 : i32
    %c0_i32_1 = arith.constant 0 : i32
    return %c0_i32, %c0_i32_0 : i32, i32
  }
  func.func @transform_6(%arg0: i32, %arg1: i32) -> (i32, i32) {
    %c0_i32 = arith.constant 0 : i32
    %c0_i32_0 = arith.constant 0 : i32
    %c0_i32_1 = arith.constant 0 : i32
    return %c0_i32, %c0_i32_0 : i32, i32
  }
  func.func @transform_7(%arg0: i32, %arg1: i32) -> (i32, i32, i32, i32) {
    %c0_i32 = arith.constant 0 : i32
    %c0_i32_0 = arith.constant 0 : i32
    %c0_i32_1 = arith.constant 0 : i32
    return %arg0, %arg1, %c0_i32, %c0_i32_0 : i32, i32, i32, i32
  }
}

</mosaic_0001>

<bundles_post_ra>
// kernel: tpu_custom_call.1
= control target key start
LH: loop header
LB: loop body
LE: loop exit
PB: predicated region body
PF: predicated region fallthrough
CT: control target
= control target key end

     0   :  { %s5682_s0 = inlined_call_operand.hbm [shape: f32[2,18,24,128], index: 0, kind: input, shape index: {}]   ;;  %s5683_s1 = inlined_call_operand.hbm [shape: bf16[128,128], index: 1, kind: input, shape index: {}]   ;;  %s5684_s2 = inlined_call_operand.vmem [shape: f32[1,128], index: 2, kind: input, shape index: {}]   ;;  %s5685_s3 = inlined_call_operand.hbm [shape: bf16[9,128,128], index: 3, kind: input, shape index: {}]   ;;  %s5686_s4 = inlined_call_operand.vmem [shape: f32[1,128], index: 4, kind: input, shape index: {}]   ;;  %s5687_s5 = inlined_call_operand.hbm [shape: bf16[128,128], index: 5, kind: input, shape index: {}]   ;;  %s5688_s6 = inlined_call_operand.vmem [shape: f32[1,128], index: 6, kind: input, shape index: {}]   ;;  %s5689_s7 = inlined_call_operand.hbm [shape: f32[2,16,16,128], index: 7, kind: output, shape index: {}]  }
   0x1   :  { %5712 = sst [smem:[#allocation20_spill]] %s5683_s1 }
   0x2   :  { %5713 = sst [smem:[#allocation21_spill]] %s5685_s3 }
   0x3   :  { %5714 = sst [smem:[#allocation22_spill]] %s5686_s4 }
   0x4   :  { %5715 = sst [smem:[#allocation23_spill]] %s5688_s6 }
   0x5   :  { %5716 = sst [smem:[#allocation24_spill]] %s5689_s7 }
   0x6   :  { %12 = vsyncpa [#allocation3], 0 }
   0x7   :  { %14 = vsyncpa [#allocation3 + $0x1], 0 }
   0x8   :  { %15 = vsyncpa [#allocation6], 0 }
   0x9   :  { %16 = vsyncpa [#allocation9], 0 }
   0xa   :  { %17 = vsyncpa [#allocation4], 0 }
   0xb   :  { %19 = vsyncpa [#allocation4 + $0x1], 0  ;;  %s4602_s24 = smov 0   ;;  %s4604_s25 = smov 0  }
   0xc   :  { %s4606_s26 = smov 0   ;;  %s4608_s27 = smov 0  }
   0xd   :  { %s4610_s28 = smov 0   ;;  %s4612_s29 = smov 0  }
   0xe   :  { %s4614_s30 = smov 0   ;;  %s4616_s8 = smov 0  }
   0xf   :  { %s4618_s9 = smov 0   ;;  %s4620_s10 = smov 0  }
  0x10   :  { %s4622_s11 = smov 0  }
  0x11 LB: > { %5717 = sst [smem:[#allocation15_spill]] %s4507_s24  ;;  %s3144_s12 = sadd.s32 4294967295, %s4547_s11   ;;  %s4547_s11 = sphi %s4622_s11, %s25_s11   ;;  %s4543_s10 = sphi %s4620_s10, %s5850_s10   ;;  %s4539_s9 = sphi %s4618_s9, %s5849_s9   ;;  %s4535_s8 = sphi %s4616_s8, %s5848_s8   ;;  %s4531_s30 = sphi %s4614_s30, %s5847_s30   ;;  %s4527_s29 = sphi %s4612_s29, %s5846_s29   ;;  %s4523_s28 = sphi %s4610_s28, %s5845_s28   ;;  %s4519_s27 = sphi %s4608_s27, %s5844_s27   ;;  %s4515_s26 = sphi %s4606_s26, %s5843_s26   ;;  %s4511_s25 = sphi %s4604_s25, %s5842_s25   ;;  %s4507_s24 = sphi %s4602_s24, %s5841_s24  }
  0x12   : > { %5718 = sst [smem:[#allocation16_spill]] %s4511_s25  ;;  %s3145_s13 = sadd.s32 4294967294, %s4547_s11  }
  0x13   : > { %5719 = sst [smem:[#allocation17_spill]] %s4535_s8  ;;  %p57_p0 = scmp.ne.s32.totalorder %s4523_s28, %s4519_s27 }
  0x14   : > { %p4658_p1 = scmp.eq.s32.totalorder %s3144_s12, 0  ;;  %p208_p2 = scmp.ne.s32.totalorder %s4515_s26, %s4511_s25 }
  0x15   : > { %p209_p4 = scmp.eq.s32.totalorder %s3144_s12, 3  ;;  %p214_p5 = scmp.ne.s32.totalorder %s4511_s25, %s4507_s24 }
  0x16   : > { %s5720_s14 = scalar_select %p4658_p1, 1, 0 }
  0x17   : > { %p4667_p3 = por %p4658_p1, %p57_p0  ;;  %p215_p6 = scmp.eq.s32.totalorder %s3145_s13, 3 }
  0x18   : > { %p4673_p7 = por %p209_p4, %p208_p2  ;;  %p3146_p8 = scmp.ge.s32.totalorder %s4547_s11, 1 }
  0x19   : > { %s5721_s16 = scalar_select %p4667_p3, 1, 0 }
  0x1a   : > { %s5722_s17 = scalar_select %p4673_p7, 1, 0 }
  0x1b   : > { %p4678_p9 = por %p215_p6, %p214_p5  ;;  %p222_p10 = scmp.lt.s32.totalorder %s4547_s11, 5 }
  0x1c   : > { %5723 = sst [smem:[#allocation18_spill]] %s5722_s17  ;;  %s4549_s20 = smov [#allocation5]  }
  0x1d   : > { %s5724_s18 = scalar_select %p4678_p9, 1, 0 }
  0x1e   : > { %p4683_p11 = pnand %p3146_p8, %p222_p10  ;;  %s234_s21 = sshll.u32 %s4549_s20, 4  ;;  %s4687_s21 = int_to_ptr.vmem [resolvable:$true] %s234_s21 }
  0x1f   : > { %5725 = sst [smem:[#allocation19_spill]] %s5724_s18  ;;  %s4550_s23 = smov [#allocation7]  }
  0x20   : > { %s5726_s19 = scalar_select %p4683_p11, 1, 0 }
  0x21   : > { %p4066_p12 = pneg %p4683_p11  ;;  %s250_s27 = sshll.u32 %s4550_s23, 4  ;;  %s4697_s27 = int_to_ptr.vmem [resolvable:$true] %s250_s27 }
  0x22   : > { %s4551_s12 = smov [#allocation8]   ;;  %s5728_s1 = sld [smem:[#allocation20_spill]] }
  0x23   : > { %p4693_p13 = pnand %p4066_p12, %p4658_p1  ;;  %s4699_s13 = sshll.u32 %s4551_s12, 4  ;;  %s267_s13 = int_to_ptr.vmem [resolvable:$true] %s4699_s13 }
  0x25   : > { %p4709_p2 = pneg %p4693_p13 }
  0x28   : > { %s4303_s20 = scalar_lea.hbm %s5728_s1, 1024 }
  0x29   : > { %p4304_p0 = scmp.ne.s32.totalorder %s5728_s1, %s4303_s20  ;;  %p4310_p6 = scmp.lt.u32.totalorder %s4303_s20, %s5728_s1 }
  0x2b   : > { %p4306_p4 = pnand %p4709_p2, %p4304_p0 }
  0x2d   : > { %p4307_p5 = pneg %p4306_p4 }
  0x2f   : > { %p4312_p8 = pnand %p4310_p6, %p4307_p5 }
  0x31   : > { %4315 = shalt.err (!%p4312_p8)
}
  0x32   : > { %s4316_s7 = scalar_lea.vmem %s4687_s21, 1024  ;;  %p4324_p7 = scmp.lt.s32.totalorder %s4687_s21, %s4687_s21 }
  0x33   : > { %p4317_p10 = scmp.ne.s32.totalorder %s4687_s21, %s4316_s7  ;;  %p4325_p1 = scmp.lt.s32.totalorder %s4316_s7, %s4316_s7 }
  0x35   : > { %p4319_p12 = pnand %p4317_p10, %p4709_p2  ;;  %p4326_p0 = por %p4325_p1, %p4324_p7 }
  0x37   : > { %p4320_p9 = pneg %p4319_p12 }
  0x39   : > { %p4327_p4 = pnand %p4326_p0, %p4320_p9 }
  0x3b   : > { %4330 = shalt.err (!%p4327_p4)
}
  0x3c   : > { %s4552_s24 = smov 64   ;;  %s4553_s15 = smov 4  }
  0x3d   : > { %4069 = dma.hbm_to_vmem [thread:$0]  (!%p4693_p13), %s5728_s1, 1024, %s4687_s21, [#allocation6], %s4552_s24, %s4552_s24, %s4553_s15  }
  0x3e   : > { %s5730_s3 = sld [smem:[#allocation21_spill]] }
  0x44   : > { %s4331_s7 = scalar_lea.hbm %s5730_s3, 9216 }
  0x45   : > { %p4332_p1 = scmp.ne.s32.totalorder %s5730_s3, %s4331_s7  ;;  %p4338_p5 = scmp.lt.u32.totalorder %s4331_s7, %s5730_s3 }
  0x47   : > { %p4334_p7 = pnand %p4332_p1, %p4709_p2 }
  0x49   : > { %p4335_p9 = pneg %p4334_p7 }
  0x4b   : > { %p4340_p6 = pnand %p4338_p5, %p4335_p9 }
  0x4d   : > { %4343 = shalt.err (!%p4340_p6)
}
  0x4e   : > { %s4344_s21 = scalar_lea.vmem %s4697_s27, 9216  ;;  %p4352_p0 = scmp.lt.s32.totalorder %s4697_s27, %s4697_s27 }
  0x4f   : > { %p4345_p8 = scmp.ne.s32.totalorder %s4697_s27, %s4344_s21  ;;  %p4353_p4 = scmp.lt.s32.totalorder %s4344_s21, %s4344_s21 }
  0x51   : > { %p4347_p10 = pnand %p4345_p8, %p4709_p2  ;;  %p4354_p1 = por %p4353_p4, %p4352_p0 }
  0x53   : > { %p4348_p12 = pneg %p4347_p10 }
  0x55   : > { %p4355_p7 = pnand %p4354_p1, %p4348_p12 }
  0x57   : > { %4358 = shalt.err (!%p4355_p7)
}
  0x58   : > { %4072 = dma.hbm_to_vmem [thread:$0]  (!%p4693_p13), %s5730_s3, 9216, %s4697_s27, [#allocation6], %s4552_s24, %s4552_s24, %s4553_s15  }
  0x59   : > { %s4359_s18 = scalar_lea.hbm %s5687_s5, 1024 }
  0x5a   : > { %p4360_p9 = scmp.ne.s32.totalorder %s5687_s5, %s4359_s18  ;;  %p4366_p8 = scmp.lt.u32.totalorder %s4359_s18, %s5687_s5 }
  0x5c   : > { %p4362_p5 = pnand %p4360_p9, %p4709_p2 }
  0x5e   : > { %p4363_p6 = pneg %p4362_p5 }
  0x60   : > { %p4368_p10 = pnand %p4366_p8, %p4363_p6 }
  0x62   : > { %4371 = shalt.err (!%p4368_p10)
}
  0x63   : > { %s4372_s21 = scalar_lea.vmem %s267_s13, 1024  ;;  %p4380_p1 = scmp.lt.s32.totalorder %s267_s13, %s267_s13 }
  0x64   : > { %p4373_p12 = scmp.ne.s32.totalorder %s267_s13, %s4372_s21  ;;  %p4381_p7 = scmp.lt.s32.totalorder %s4372_s21, %s4372_s21 }
  0x66   : > { %p4375_p0 = pnand %p4373_p12, %p4709_p2  ;;  %p4382_p3 = por %p4381_p7, %p4380_p1 }
  0x68   : > { %p4376_p4 = pneg %p4375_p0 }
  0x6a   : > { %p4383_p11 = pnand %p4382_p3, %p4376_p4 }
  0x6c   : > { %4386 = shalt.err (!%p4383_p11)
}
  0x6d   : > { %4075 = dma.hbm_to_vmem [thread:$0]  (!%p4693_p13), %s5687_s5, 1024, %s267_s13, [#allocation9], %s4552_s24, %s4552_s24, %s4553_s15  }
  0x6e   : > { %s34_s17 = sadd.s32 1, %s4539_s9  ;;  %s37_s22 = sadd.s32 1, %s4543_s10 }
  0x6f   : > { %p35_p3 = scmp.ge.s32.totalorder %s34_s17, 2  ;;  %s44_s6 = sadd.s32 1, %s4527_s29 }
  0x70   : > { %p51_p11 = scmp.ne.s32.totalorder %s4527_s29, %s4523_s28  ;;  %p52_p2 = scmp.eq.s32.totalorder %s4547_s11, 0 }
  0x71   : > { %s5852_s17 = smov (%p35_p3, %s34_s17), 0  ;;  %s5854_s22 = smov (!%p35_p3, %s37_s22), %s4543_s10 }
  0x72   : > { %s194_s25 = ssub.s32 %s4539_s9, %s5852_s17  ;;  %p39_p9 = scmp.ge.s32.totalorder %s5854_s22, 2 }
  0x73   : > { %p4087_p5 = scmp.lt.s32.totalorder %s4547_s11, 4  ;;  %p4793_p13 = por %p52_p2, %p51_p11 }
  0x74   : > { %s283_s24 = sand.u32 1, %s4527_s29   ;;  %s5856_s22 = smov (%p39_p9, %s5854_s22), 0 }
  0x75   : > { %s4047_s15 = smul.u32 432, %s283_s24  ;;  %s41_s8 = ssub.s32 %s4543_s10, %s5856_s22 }
  0x76   : > { %s4048_s18 = smul.u32 6912, %s4543_s10  ;;  %p42_p6 = scmp.eq.s32.totalorder %s41_s8, 0 }
  0x77   : > { %s195_s20 = sor.u32 %s194_s25, %s41_s8  ;;  %s5732_s12 = sadd.s32 1, %s4515_s26 }
  0x78   : > { %p196_p8 = scmp.eq.s32.totalorder %s195_s20, 0  ;;  %s4814_s4 = scalar_lea.hbm %s5682_s0, %s4048_s18 }
  0x79   : > { %s4804_s23 = scalar_select %p42_p6, %s4527_s29, %s44_s6  }
  0x7a   : > { %s4809_s7 = scalar_select %p196_p8, %s4515_s26, %s5732_s12  }
  0x7b   : > { %s287_s1 = scalar_lea.vmem [#allocation2], %s4047_s15  ;;  %p4822_p10 = pnand %p4087_p5, %p4793_p13 }
  0x7c   : > { %s294_s3 = sshll.u32 %s287_s1, 4  ;;  %s4826_s25 = scalar_lea.sflag [#allocation3], %s283_s24  ;;  %s4816_s3 = int_to_ptr.vmem [resolvable:$true] %s294_s3 }
  0x7d   : > { %s4387_s8 = scalar_lea.hbm %s4814_s4, 6912  ;;  %p4389_p0 = pneg %p4822_p10 }
  0x7e   : > { %p4388_p12 = scmp.ne.s32.totalorder %s4814_s4, %s4387_s8  ;;  %s4392_s13 = scalar_lea.hbm %s5682_s0, 13824 }
  0x7f   : > { %p4393_p7 = scmp.lt.u32.totalorder %s4814_s4, %s5682_s0  ;;  %p4394_p3 = scmp.lt.u32.totalorder %s4392_s13, %s4387_s8 }
  0x80   : > { %p4390_p4 = pnand %p4389_p0, %p4388_p12  ;;  %p4396_p2 = scmp.lt.u32.totalorder %s4387_s8, %s4814_s4 }
  0x81   : > { %p4395_p11 = por %p4394_p3, %p4393_p7 }
  0x82   : > { %p4391_p1 = pneg %p4390_p4 }
  0x83   : > { %p4397_p9 = por %p4396_p2, %p4395_p11 }
  0x85   : > { %p4398_p5 = pnand %p4397_p9, %p4391_p1 }
  0x87   : > { %4401 = shalt.err (!%p4398_p5)
}
  0x88   : > { %s4402_s24 = scalar_lea.vmem %s4816_s3, 6912  ;;  %s4554_s12 = smov [#allocation2]  }
  0x89   : > { %p4403_p13 = scmp.ne.s32.totalorder %s4816_s3, %s4402_s24  ;;  %s4407_s21 = sshll.u32 %s4554_s12, 4  ;;  %s4408_s21 = int_to_ptr.vmem [resolvable:$false] %s4407_s21 }
  0x8a   : > { %s4409_s27 = scalar_lea.vmem %s4408_s21, 13824  ;;  %p4410_p12 = scmp.lt.s32.totalorder %s4816_s3, %s4408_s21 }
  0x8b   : > { %p4405_p6 = pnand %p4403_p13, %p4389_p0  ;;  %p4411_p4 = scmp.lt.s32.totalorder %s4409_s27, %s4402_s24 }
  0x8d   : > { %p4406_p8 = pneg %p4405_p6  ;;  %p4412_p7 = por %p4411_p4, %p4410_p12 }
  0x8f   : > { %p4413_p3 = pnand %p4412_p7, %p4406_p8 }
  0x91   : > { %4416 = shalt.err (!%p4413_p3)
}
  0x92   : > { %s4555_s8 = smov 128   ;;  %s4556_s1 = smov 8  }
  0x93   : > { %4079 = dma.hbm_to_vmem [thread:$0]  (!%p4822_p10), %s4814_s4, 6912, %s4816_s3, %s4826_s25, %s4555_s8, %s4555_s8, %s4556_s1  }
  0x94   : > { %p5734_p0 = scmp.ne.s32.totalorder %s5726_s19, 0 }
  0x95   : > { %s308_s15 = sand.u32 (!%p5734_p0), 1, %s4523_s28   ;;  %p5735_p1 = scmp.ne.s32.totalorder (!%p5734_p0), %s5721_s16, 0 }
  0x96   : > { %306 = sbr.rel (%p5734_p0) target bundleno = 1160 (0x488), region = 48  ;;  %s309_s18 = scalar_lea.sflag (!%p5734_p0), [#allocation3], %s308_s15 }
  0x97   : > { %s4857_s13 = smul.u32 (!%p5734_p0), 432, %s308_s15 }
  0x99   : > { %s312_s20 = scalar_lea.vmem (!%p5734_p0), [#allocation2], %s4857_s13 }
  0x9d   : > { %4490 = dma.done.wait (%p5735_p1), %s309_s18, 6912  }
  0x9e   : > { %4492 = vsyncadd (%p5735_p1), %s309_s18, 4294960384  ;;  %p5736_p11 = scmp.ne.s32.totalorder %s5720_s14, 0 }
  0xa0   : > { %4494 = dma.done.wait (%p5736_p11), [#allocation6], 10240  }
  0xa1   : > { %4496 = vsyncadd (%p5736_p11), [#allocation6], 4294957056 }
  0xa2   : > { %4498 = dma.done.wait (%p5736_p11), [#allocation9], 1024  }
  0xa3   : > { %4500 = vsyncadd (%p5736_p11), [#allocation9], 4294966272  ;;  %v4557_v0 = vmov 0.0   ;;  %vm4558_vm0 = vmmov 0   ;;  %v4191_v1 = vld [vmem:[#allocation5] sm:$0xff]   ;;  %v4192_v2 = vld [vmem:[#allocation5 + $0x8] sm:$0xff]  }
  0xa4   : > { %3523 = vmatprep.subr.bf16.mxu0 %v4557_v0  ;;  %3539 = vmatprep.mubr.msk.bf16.mxu0 %vm4558_vm0, %v4557_v0  ;;  %v4193_v3 = vld [vmem:[#allocation5 + $0x10] sm:$0xff]   ;;  %v4194_v4 = vld [vmem:[#allocation5 + $0x18] sm:$0xff]   ;;  %v4195_v5 = vld [vmem:[#allocation5 + $0x20] sm:$0xff]   ;;  %s3158_s3 = smul.u32 192, %s4531_s30  ;;  %s3157_s16 = sshll.u32 %s4531_s30, 3  ;;  %vm5703_vm11 = vcmask 1046528  }
  0xa5   : > { %3524 = vmatpush3.bf16.msra.mxu0 %v4191_v1  ;;  %v4196_v6 = vld [vmem:[#allocation5 + $0x28] sm:$0xff]   ;;  %v4199_v7 = vld [vmem:[#allocation7 + $0x80] sm:$0xff]   ;;  %v4197_v8 = vld [vmem:[#allocation5 + $0x30] sm:$0xff]   ;;  %vm5702_vm12 = vsmask.f32 7424  ;;  %s5814_s24 = sld [smem:[#allocation22_spill]] }
  0xa6   : > { %3525 = vmatprep.subr.bf16.mxu0 %v4557_v0  ;;  %s4883_s14 = scalar_lea.vmem %s312_s20, %s3158_s3 [#allocation2]  ;;  %3663 = vmatprep.subr.bf16.mxu1 %v4199_v7  ;;  %v4198_v9 = vld [vmem:[#allocation5 + $0x38] sm:$0xff]   ;;  %v4200_v12 = vld [vmem:[#allocation7 + $0x40] sm:$0xff]   ;;  %v4201_v62 = vld [vmem:[#allocation7 + $0x88] sm:$0xff]   ;;  %s5819_s12 = sld [smem:[#allocation16_spill]] }
  0xa7   : > { %3664 = vmatpush3.bf16.msra.mxu1 %v4199_v7  ;;  %v360_v10 = vld [vmem:[%s4883_s14] sm:$0xff]  ;;  %v361_v11 = vld [vmem:[%s4883_s14 + $0x8] sm:$0xff]  ;;  %v362_v14 = vld [vmem:[%s4883_s14 + $0x10] sm:$0xff]  ;;  %s5824_s1 = sld [smem:[#allocation23_spill]]  ;;  %s5830_s18 = sld [smem:[#allocation17_spill]] }
  0xa8   : > { %v390_v13 = vpack.c.bf16 %v361_v11, %v360_v10  ;;  %v363_v15 = vld [vmem:[%s4883_s14 + $0x18] sm:$0xff]  ;;  %v364_v16 = vld [vmem:[%s4883_s14 + $0x20] sm:$0xff]  ;;  %v365_v17 = vld [vmem:[%s4883_s14 + $0x28] sm:$0xff]  ;;  %3665 = vmatprep.subr.bf16.mxu1 %v4201_v62  ;;  %s3339_s20 = sshll.u32 %s4531_s30, 4  ;;  %s5834_s19 = sld [smem:[#allocation18_spill]] }
  0xa9   : > { %3526 = vmatpush3.bf16.msra.mxu0 %v4192_v2  ;;  %v3334_v18 = vpack.c.bf16 %v363_v15, %v362_v14  ;;  %v392_v19 = vpack.c.bf16 %v364_v16, %v363_v15  ;;  %v393_v20 = vpack.c.bf16 %v365_v17, %v365_v17  ;;  %v366_v24 = vld [vmem:[%s4883_s14 + $0x30] sm:$0xff]  ;;  %v367_v25 = vld [vmem:[%s4883_s14 + $0x38] sm:$0xff]  ;;  %v368_v27 = vld [vmem:[%s4883_s14 + $0x40] sm:$0xff]  ;;  %s5835_s25 = sld [smem:[#allocation24_spill]] }
  0xaa   : > { %3527 = vmatprep.subr.bf16.mxu0 %v4557_v0  ;;  %v394_v26 = vpack.c.bf16 %v367_v25, %v366_v24  ;;  %v369_v28 = vld [vmem:[%s4883_s14 + $0x48] sm:$0xff]  ;;  %v370_v29 = vld [vmem:[%s4883_s14 + $0x50] sm:$0xff]  ;;  %v371_v30 = vld [vmem:[%s4883_s14 + $0x58] sm:$0xff] }
  0xab   : > { %v434_v21 = vunpack.c.h.b16 %v392_v19  ;;  %v435_v22 = vunpack.c.l.b16 %v393_v20  ;;  %v3335_v31 = vpack.c.bf16 %v369_v28, %v368_v27  ;;  %v396_v32 = vpack.c.bf16 %v370_v29, %v369_v28  ;;  %v372_v37 = vld [vmem:[%s4883_s14 + $0x60] sm:$0xff]  ;;  %v373_v38 = vld [vmem:[%s4883_s14 + $0x68] sm:$0xff]  ;;  %v374_v40 = vld [vmem:[%s4883_s14 + $0x70] sm:$0xff]  ;;  %3666 = vmatpush3.bf16.msra.mxu1 %v4201_v62 }
  0xac   : > { %v397_v33 = vpack.c.bf16 %v371_v30, %v371_v30  ;;  %v398_v39 = vpack.c.bf16 %v373_v38, %v372_v37  ;;  %v375_v41 = vld [vmem:[%s4883_s14 + $0x78] sm:$0xff]  ;;  %v376_v42 = vld [vmem:[%s4883_s14 + $0x80] sm:$0xff]  ;;  %v377_v43 = vld [vmem:[%s4883_s14 + $0x88] sm:$0xff]  ;;  %v4952_v29 = vstv %s3157_s16  ;;  %s352_s21 = sand.u32 1, %s5819_s12  }
  0xad   : > { %3528 = vmatpush3.bf16.msra.mxu0 %v4193_v3  ;;  %v485_v23 = vpack.c.b16 %v435_v22, %v434_v21  ;;  %v440_v34 = vunpack.c.h.b16 %v396_v32  ;;  %v3336_v44 = vpack.c.bf16 %v375_v41, %v374_v40  ;;  %v400_v45 = vpack.c.bf16 %v376_v42, %v375_v41  ;;  %v378_v50 = vld [vmem:[%s4883_s14 + $0x90] sm:$0xff]  ;;  %v379_v51 = vld [vmem:[%s4883_s14 + $0x98] sm:$0xff]  ;;  %v380_v53 = vld [vmem:[%s4883_s14 + $0xa0] sm:$0xff]  ;;  %s3156_s15 = sshll.u32 %s352_s21, 7  ;;  %s3330_s3 = sshll.u32 %s5830_s18, 5 }
  0xae   : > { %3529 = vmatprep.subr.bf16.mxu0 %v4557_v0  ;;  %v441_v35 = vunpack.c.l.b16 %v397_v33  ;;  %v401_v46 = vpack.c.bf16 %v377_v43, %v377_v43  ;;  %v402_v52 = vpack.c.bf16 %v379_v51, %v378_v50  ;;  %v381_v54 = vld [vmem:[%s4883_s14 + $0xa8] sm:$0xff]  ;;  %v382_v55 = vld [vmem:[%s4883_s14 + $0xb0] sm:$0xff]  ;;  %v383_v56 = vld [vmem:[%s4883_s14 + $0xb8] sm:$0xff]  ;;  %vm758_vm1 = vcmp.ge.s32.totalorder %v4952_v29, 1  ;;  %s5561_s13 = scalar_lea.vmem [#allocation10], %s3156_s15  ;;  %s3023_s16 = sadd.s32 %s3339_s20, %s3330_s3 }
  0xaf   : > { %v446_v47 = vunpack.c.h.b16 %v400_v45  ;;  %v3337_v57 = vpack.c.bf16 %v381_v54, %v380_v53  ;;  %v404_v58 = vpack.c.bf16 %v382_v55, %v381_v54  ;;  %v405_v59 = vpack.c.bf16 %v383_v56, %v383_v56  ;;  %v4202_v1 = vld [vmem:[#allocation7 + $0x48] sm:$0xff]   ;;  %v4203_v2 = vld [vmem:[#allocation7 + $0x90] sm:$0xff]   ;;  %v4208_v11 = vld [vmem:[#allocation7 + $0x60] sm:$0xff]   ;;  %s3331_s30 = sshll.u32 %s3023_s16, 7  ;;  %s5621_s27 = scalar_lea.sflag [#allocation4], %s352_s21 }
  0xb0   : > { %v488_v36 = vpack.c.b16 %v441_v35, %v440_v34  ;;  %v447_v48 = vunpack.c.l.b16 %v401_v46  ;;  %3667 = vmatprep.subr.bf16.mxu1 %v4203_v2  ;;  %v4204_v3 = vld [vmem:[#allocation7 + $0x50] sm:$0xff]   ;;  %v389_v14 = vld [vmem:[%s4883_s14 + $0xe8] sm:$0xff]  ;;  %v4213_v24 = vld [vmem:[#allocation7 + $0xb8] sm:$0xff]   ;;  %vm768_vm2 = vcmp.le.s32.totalorder %v4952_v29, 16  ;;  %p5837_p2 = scmp.ne.s32.totalorder %s5834_s19, 0  ;;  %s4559_s15 = smov [#allocation10]  }
  0xb1   : > { %3530 = vmatpush3.bf16.msra.mxu0 %v4194_v4  ;;  %v452_v60 = vunpack.c.h.b16 %v404_v58  ;;  %v453_v61 = vunpack.c.l.b16 %v405_v59  ;;  %v384_v4 = vld [vmem:[%s4883_s14 + $0xc0] sm:$0xff]  ;;  %3668 = vmatpush3.bf16.msra.mxu1 %v4203_v2  ;;  %v386_v10 = vld [vmem:[%s4883_s14 + $0xd0] sm:$0xff]  ;;  %v4209_v15 = vld [vmem:[#allocation7 + $0xa8] sm:$0xff]   ;;  %s4421_s18 = sshll.u32 %s4559_s15, 4  ;;  %s4422_s18 = int_to_ptr.vmem [resolvable:$false] %s4421_s18 }
  0xb2   : > { %3531 = vmatprep.subr.bf16.mxu0 %v4557_v0  ;;  %v491_v49 = vpack.c.b16 %v447_v48, %v446_v47  ;;  %v4210_v19 = vld [vmem:[#allocation7 + $0x68] sm:$0xff]   ;;  %v4211_v20 = vld [vmem:[#allocation7 + $0xb0] sm:$0xff]   ;;  %v4945_v27 = vld [vmem:[#allocation7 + $0xc0] sm:$0xff]   ;;  %v745_v48 = vadd.s32 1, %v4952_v29  ;;  %s4423_s20 = scalar_lea.vmem %s4422_s18, 4096 }
  0xb3   : > { %v494_v63 = vpack.c.b16 %v453_v61, %v452_v60  ;;  %v4948_v28 = vld [vmem:[#allocation7] sm:$0xff]   ;;  %vm4964_vm3 = vmand %vm758_vm1, %vm768_vm2 }
  0xb4   : > { %vm759_vm8 = vcmp.ge.s32.totalorder %v745_v48, 1  ;;  %vm769_vm9 = vcmp.le.s32.totalorder %v745_v48, 16 }
  0xb5   : > { %3532 = vmatpush3.bf16.msra.mxu0 %v4195_v5  ;;  %v385_v5 = vld [vmem:[%s4883_s14 + $0xc8] sm:$0xff]  ;;  %vm4995_vm10 = vmand %vm759_vm8, %vm769_vm9 }
  0xb6   : > { %3533 = vmatprep.subr.bf16.mxu0 %v4557_v0  ;;  %v406_v7 = vpack.c.bf16 %v385_v5, %v384_v4 }
  0xb9   : > { %3534 = vmatpush3.bf16.msra.mxu0 %v4196_v6  ;;  %v4205_v6 = vld [vmem:[#allocation7 + $0x98] sm:$0xff]  }
  0xba   : > { %3535 = vmatprep.subr.bf16.mxu0 %v4557_v0  ;;  %3669 = vmatprep.subr.bf16.mxu1 %v4205_v6 }
  0xbb   : > { %3670 = vmatpush3.bf16.msra.mxu1 %v4205_v6 }
  0xbd   : > { %3536 = vmatpush3.bf16.msra.mxu0 %v4197_v8  ;;  %v4206_v8 = vld [vmem:[#allocation7 + $0x58] sm:$0xff]  }
  0xbe   : > { %3537 = vmatprep.subr.bf16.mxu0 %v4557_v0 }
  0xc1   : > { %3538 = vmatpush3.bf16.msra.mxu0 %v4198_v9  ;;  %v4207_v9 = vld [vmem:[#allocation7 + $0xa0] sm:$0xff]  }
  0xc2   : > { %3599 = vmatprep.subr.bf16.mxu0 %v4200_v12  ;;  %3671 = vmatprep.subr.bf16.mxu1 %v4207_v9 }
  0xc3   : > { %3672 = vmatpush3.bf16.msra.mxu1 %v4207_v9 }
  0xc4   : > { %3540 = vmatmul.mubr.bf16.vlgmr.msra.gmra.mrb[0].mxu0 %v390_v13  ;;  %v388_v13 = vld [vmem:[%s4883_s14 + $0xe0] sm:$0xff]  ;;  %3673 = vmatprep.subr.bf16.mxu1 %v4209_v15 }
  0xc5   : > { %3543 = vmatprep.mubr.msk.bf16.mxu0 %vm4558_vm0, %v4557_v0  ;;  %3600 = vmatpush3.bf16.msra.mxu0 %v4200_v12  ;;  %v387_v12 = vld [vmem:[%s4883_s14 + $0xd8] sm:$0xff] }
  0xc6   : > { %3601 = vmatprep.subr.bf16.mxu0 %v4202_v1  ;;  %v408_v16 = vpack.c.bf16 %v388_v13, %v387_v12  ;;  %v3338_v17 = vpack.c.bf16 %v387_v12, %v386_v10  ;;  %v746_v10 = vadd.s32 2, %v4952_v29 }
  0xc7   : > { %3674 = vmatpush3.bf16.msra.mxu1 %v4209_v15 }
  0xc8   : > { %v458_v21 = vunpack.c.h.b16 %v408_v16  ;;  %3675 = vmatprep.subr.bf16.mxu1 %v4211_v20  ;;  %vm760_vm15 = vcmp.ge.s32.totalorder %v746_v10, 1 }
  0xc9   : > { %3602 = vmatpush3.bf16.msra.mxu0 %v4202_v1 }
  0xca   : > { %3603 = vmatprep.subr.bf16.mxu0 %v4204_v3 }
  0xcb   : > { %3676 = vmatpush3.bf16.msra.mxu1 %v4211_v20 }
  0xcc   : > { %3544 = vmatmul.mubr.bf16.gmra.mrb[4].mxu0 %v3334_v18  ;;  %v409_v18 = vpack.c.bf16 %v389_v14, %v389_v14  ;;  %3677 = vmatprep.subr.bf16.mxu1 %v4213_v24 }
  0xcd   : > { %3547 = vmatprep.mubr.msk.bf16.mxu0 %vm4558_vm0, %v4557_v0  ;;  %3604 = vmatpush3.bf16.msra.mxu0 %v4204_v3 }
  0xce   : > { %3605 = vmatprep.subr.bf16.mxu0 %v4206_v8  ;;  %v459_v22 = vunpack.c.l.b16 %v409_v18 }
  0xcf   : > { %3678 = vmatpush3.bf16.msra.mxu1 %v4213_v24 }
  0xd0   : > { %v497_v25 = vpack.c.b16 %v459_v22, %v458_v21  ;;  %3695 = vmatprep.subr.bf16.mxu1 %v4945_v27 }
  0xd1   : > { %3606 = vmatpush3.bf16.msra.mxu0 %v4206_v8 }
  0xd2   : > { %3607 = vmatprep.subr.bf16.mxu0 %v4208_v11 }
  0xd4   : > { %3548 = vmatmul.mubr.bf16.gmra.mrb[8].mxu0 %v485_v23  ;;  %v4212_v23 = vld [vmem:[#allocation7 + $0x70] sm:$0xff]  }
  0xd5   : > { %3551 = vmatprep.mubr.msk.bf16.mxu0 %vm4558_vm0, %v4557_v0  ;;  %3608 = vmatpush3.bf16.msra.mxu0 %v4208_v11 }
  0xd6   : > { %3609 = vmatprep.subr.bf16.mxu0 %v4210_v19 }
  0xd9   : > { %3610 = vmatpush3.bf16.msra.mxu0 %v4210_v19 }
  0xda   : > { %3611 = vmatprep.subr.bf16.mxu0 %v4212_v23 }
  0xdc   : > { %3552 = vmatmul.mubr.bf16.gmra.mrb[12].mxu0 %v394_v26  ;;  %v4214_v26 = vld [vmem:[#allocation7 + $0x78] sm:$0xff]  }
  0xdd   : > { %3555 = vmatprep.mubr.msk.bf16.mxu0 %vm4558_vm0, %v4557_v0  ;;  %3612 = vmatpush3.bf16.msra.mxu0 %v4212_v23 }
  0xde   : > { %3613 = vmatprep.subr.bf16.mxu0 %v4214_v26 }
  0xe1   : > { %3614 = vmatpush3.bf16.msra.mxu0 %v4214_v26  ;;  %v4272_v26 = vld [vmem:[#allocation8 + $0x8] sm:$0xff]  }
  0xe2   : > { %3631 = vmatprep.subr.bf16.mxu0 %v4948_v28 }
  0xe4   : > { %3556 = vmatmul.mubr.bf16.gmra.mrb[16].mxu0 %v3335_v31  ;;  %v4959_v31 = vld [vmem:[%s5684_s2] ss:$0 sm:$0xff] }
  0xe5   : > { %3559 = vmatprep.mubr.msk.bf16.mxu0 %vm4558_vm0, %v4557_v0 }
  0xec   : > { %3560 = vmatmul.mubr.bf16.gmra.mrb[20].mxu0 %v488_v36 }
  0xed   : > { %3563 = vmatprep.mubr.msk.bf16.mxu0 %vm4558_vm0, %v4557_v0 }
  0xf4   : > { %3564 = vmatmul.mubr.bf16.gmra.mrb[24].mxu0 %v398_v39 }
  0xf5   : > { %3567 = vmatprep.mubr.msk.bf16.mxu0 %vm4558_vm0, %v4557_v0 }
  0xfc   : > { %3568 = vmatmul.mubr.bf16.gmra.mrb[28].mxu0 %v3336_v44 }
  0xfd   : > { %3571 = vmatprep.mubr.msk.bf16.mxu0 %vm4558_vm0, %v4557_v0 }
 0x104   : > { %3572 = vmatmul.mubr.bf16.gmra.mrb[32].mxu0 %v491_v49 }
 0x105   : > { %3575 = vmatprep.mubr.msk.bf16.mxu0 %vm4558_vm0, %v4557_v0 }
 0x10c   : > { %3576 = vmatmul.mubr.bf16.gmra.mrb[36].mxu0 %v402_v52 }
 0x10d   : > { %3579 = vmatprep.mubr.msk.bf16.mxu0 %vm4558_vm0, %v4557_v0 }
 0x114   : > { %3580 = vmatmul.mubr.bf16.gmra.mrb[40].mxu0 %v3337_v57 }
 0x115   : > { %3583 = vmatprep.mubr.msk.bf16.mxu0 %vm4558_vm0, %v4557_v0 }
 0x11c   : > { %3584 = vmatmul.mubr.bf16.gmra.mrb[44].mxu0 %v494_v63 }
 0x11d   : > { %3587 = vmatprep.mubr.msk.bf16.mxu0 %vm4558_vm0, %v4557_v0 }
 0x124   : > { %3588 = vmatmul.mubr.bf16.gmra.mrb[48].mxu0 %v406_v7 }
 0x125   : > { %3591 = vmatprep.mubr.msk.bf16.mxu0 %vm4558_vm0, %v4557_v0 }
 0x12c   : > { %3592 = vmatmul.mubr.bf16.gmra.mrb[52].mxu0 %v3338_v17 }
 0x12d   : > { %3595 = vmatprep.mubr.msk.bf16.mxu0 %vm4558_vm0, %v4557_v0  ;;  %v754_v0 = vlaneseq  ;;  %vm770_vm0 = vcmp.le.s32.totalorder %v746_v10, 16  ;;  %v4223_v10 = vld [vmem:[#allocation7 + $0xe0] sm:$0xff]  }
 0x12e   : > { %vm5023_vm1 = vmand %vm760_vm15, %vm770_vm0 }
 0x12f   : > { %v4954_v30 = vshrl.u32 %v754_v0, 7 }
 0x131   : > { %vm5704_vm4 = vcmp.ge.s32.totalorder %v4954_v30, 1  ;;  %v4971_v40 = vadd.s32 16, %v4954_v30 }
 0x132   : > { %vm4977_vm5 = vmand %vm4964_vm3, %vm5704_vm4 }
 0x133   : > { %vm5706_vm6 = vcmp.le.s32.totalorder %v4971_v40, 16  ;;  %vm5004_vm13 = vmand %vm4995_vm10, %vm5704_vm4 }
 0x134   : > { %3596 = vmatmul.mubr.bf16.gmra.mrb[56].mxu0 %v497_v25  ;;  %vm826_vm7 = vmand %vm4964_vm3, %vm5706_vm6 }
 0x135   : > { %vm829_vm14 = vmand %vm4995_vm10, %vm5706_vm6 }
 0x136   : > { %vm5032_vm2 = vmand %vm5023_vm1, %vm5704_vm4 }
 0x197   : > { %v595_v32 = vpop.f32.mrb[0].mxu0 }
 0x198   : > { %v596_v33 = vadd.f32 %v4959_v31, %v595_v32  ;;  %v3541_v35 = vpop.f32.mrb[1].mxu0 }
 0x199   : > { %v598_v36 = vpop.f32.mrb[2].mxu0 }
 0x19a   : > { %v714_v37 = vmax.f32 %v596_v33, 0.0  ;;  %v599_v38 = vadd.f32 %v4959_v31, %v598_v36  ;;  %v3542_v39 = vpop.f32.mrb[3].mxu0 }
 0x19c   : > { %v715_v42 = vmax.f32 %v599_v38, 0.0  ;;  %v854_v43 = vsel %vm4977_vm5, %v714_v37, 0.0 }
 0x19e   : > { %v855_v44 = vsel %vm4964_vm3, %v715_v42, 0.0  ;;  %v4985_v45 = vpack.c.bf16 %v715_v42, %v714_v37 }
 0x19f   : > { %v884_v46 = vpack.c.bf16 %v855_v44, %v854_v43  ;;  %v603_v47 = vpop.f32.mrb[4].mxu0  ;;  %v4217_v43 = vld [vmem:[#allocation7 + $0xc8] sm:$0xff]  }
 0x1a0   : > { %v604_v49 = vadd.f32 %v4959_v31, %v603_v47  ;;  %v3545_v50 = vpop.f32.mrb[5].mxu0 }
 0x1a1   : > { %v924_v51 = vshll.u32 %v884_v46, 16  ;;  %v606_v52 = vpop.f32.mrb[6].mxu0  ;;  %v1349_v62 = vrot.slane %v884_v46, 1  ;;  %v922_v1 = vshrl.u32 %v884_v46, 16  ;;  %v4218_v50 = vld [vmem:[#allocation7 + $0x8] sm:$0xff]  }
 0x1a2   : > { %v716_v53 = vmax.f32 %v604_v49, 0.0  ;;  %v3546_v54 = vpop.f32.mrb[7].mxu0  ;;  %v607_v56 = vadd.f32 %v4959_v31, %v606_v52  ;;  %v4232_v46 = vld [vmem:[#allocation7 + $0x108] sm:$0xff]  }
 0x1a3   : > { %v926_v58 = vrot.slane %v924_v51, 1 }
 0x1a4   : > { %v856_v55 = vsel %vm826_vm7, %v716_v53, 0.0  ;;  %v717_v2 = vmax.f32 %v607_v56, 0.0  ;;  %vm832_vm7 = vmand %vm5023_vm1, %vm5706_vm6 }
 0x1a5   : > { %v885_v57 = vpack.c.bf16 %v856_v55, %v856_v55  ;;  %v927_v9 = vor.u32 %v926_v58, %v922_v1  ;;  %v4219_v55 = vld [vmem:[#allocation7 + $0xd0] sm:$0xff]   ;;  %v747_v58 = vadd.s32 3, %v4952_v29 }
 0x1a6   : > { %v857_v15 = vsel %vm5004_vm13, %v717_v2, 0.0 }
 0x1a7   : > { %v929_v60 = vshll.u32 %v885_v57, 16  ;;  %v611_v61 = vpop.f32.mrb[8].mxu0  ;;  %v1350_v63 = vrot.slane %v885_v57, 1  ;;  %vm761_vm8 = vcmp.ge.s32.totalorder %v747_v58, 1  ;;  %vm771_vm9 = vcmp.le.s32.totalorder %v747_v58, 16 }
 0x1a8   : > { %v612_v3 = vadd.f32 %v4959_v31, %v611_v61  ;;  %v3549_v4 = vpop.f32.mrb[9].mxu0  ;;  %v4220_v61 = vld [vmem:[#allocation7 + $0x10] sm:$0xff]  }
 0x1a9   : > { %v931_v5 = vrot.slane %v929_v60, 1  ;;  %v614_v7 = vpop.f32.mrb[10].mxu0  ;;  %v1351_v8 = vsel %vm5703_vm11, %v1349_v62, %v1350_v63 }
 0x1aa   : > { %v718_v11 = vmax.f32 %v612_v3, 0.0  ;;  %v615_v12 = vadd.f32 %v4959_v31, %v614_v7  ;;  %v3550_v13 = vpop.f32.mrb[11].mxu0  ;;  %3679 = vmatprep.mubr.bf16.mxu1 %v1351_v8  ;;  %v4221_v3 = vld [vmem:[#allocation7 + $0xd8] sm:$0xff]  }
 0x1ab   : > { %v932_v14 = vsel %vm5702_vm12, %v927_v9, %v931_v5  ;;  %v4222_v5 = vld [vmem:[#allocation7 + $0x18] sm:$0xff]  }
 0x1ac   : > { %v858_v16 = vsel %vm4995_vm10, %v718_v11, 0.0  ;;  %v5020_v17 = vpack.c.bf16 %v718_v11, %v717_v2  ;;  %v719_v18 = vmax.f32 %v615_v12, 0.0  ;;  %3615 = vmatprep.mubr.bf16.mxu0 %v932_v14 }
 0x1ad   : > { %v886_v19 = vpack.c.bf16 %v858_v16, %v857_v15 }
 0x1ae   : > { %v859_v20 = vsel %vm829_vm14, %v719_v18, 0.0  ;;  %vm5059_vm14 = vmand %vm761_vm8, %vm771_vm9 }
 0x1af   : > { %v936_v21 = vshll.u32 %v886_v19, 16  ;;  %v887_v22 = vpack.c.bf16 %v859_v20, %v859_v20  ;;  %v619_v23 = vpop.f32.mrb[12].mxu0  ;;  %v934_v24 = vshrl.u32 %v886_v19, 16  ;;  %v1352_v37 = vrot.slane %v886_v19, 1  ;;  %v4224_v20 = vld [vmem:[#allocation7 + $0x20] sm:$0xff]   ;;  %vm5068_vm15 = vmand %vm5059_vm14, %vm5704_vm4 }
 0x1b0   : > { %v620_v25 = vadd.f32 %v4959_v31, %v619_v23  ;;  %v3553_v0 = vpop.f32.mrb[13].mxu0  ;;  %vm835_vm0 = vmand %vm5059_vm14, %vm5706_vm6 }
 0x1b1   : > { %v938_v32 = vrot.slane %v936_v21, 1  ;;  %v941_v33 = vshll.u32 %v887_v22, 16  ;;  %v1353_v35 = vrot.slane %v887_v22, 1  ;;  %v622_v36 = vpop.f32.mrb[14].mxu0  ;;  %v748_v0 = vadd.s32 4, %v4952_v29  ;;  %v4265_v22 = vld [vmem:[#allocation7 + $0x210] sm:$0xff]  }
 0x1b2   : > { %v720_v38 = vmax.f32 %v620_v25, 0.0  ;;  %v623_v39 = vadd.f32 %v4959_v31, %v622_v36  ;;  %v3554_v42 = vpop.f32.mrb[15].mxu0  ;;  %v4225_v36 = vld [vmem:[#allocation7 + $0xe8] sm:$0xff]  }
 0x1b3   : > { %v943_v44 = vrot.slane %v941_v33, 1  ;;  %v5037_v47 = vsel %vm5703_vm11, %v1352_v37, %v1353_v35  ;;  %v939_v48 = vor.u32 %v938_v32, %v934_v24  ;;  %vm772_vm8 = vcmp.le.s32.totalorder %v748_v0, 16 }
 0x1b4   : > { %v721_v49 = vmax.f32 %v623_v39, 0.0  ;;  %3680 = vmatmul.mubr.bf16.vlgmr.msra.gmra.mrb[0].mxu1 %v5037_v47  ;;  %v860_v52 = vsel %vm5032_vm2, %v720_v38, 0.0 }
 0x1b5   : > { %v5041_v51 = vsel %vm5702_vm12, %v939_v48, %v943_v44  ;;  %3696 = vmatpush3.bf16.msra.mxu1 %v4945_v27  ;;  %v4226_v44 = vld [vmem:[#allocation7 + $0x28] sm:$0xff]  }
 0x1b6   : > { %v861_v53 = vsel %vm5023_vm1, %v721_v49, 0.0  ;;  %v5048_v54 = vpack.c.bf16 %v721_v49, %v720_v38  ;;  %3616 = vmatmul.mubr.bf16.vlgmr.msra.gmra.mrb[60].mxu0 %v5041_v51  ;;  %3697 = vmatprep.subr.bf16.mxu1 %v4217_v43 }
 0x1b7   : > { %v888_v56 = vpack.c.bf16 %v861_v53, %v860_v52  ;;  %v627_v57 = vpop.f32.mrb[16].mxu0  ;;  %3632 = vmatpush3.bf16.msra.mxu0 %v4948_v28 }
 0x1b8   : > { %v628_v27 = vadd.f32 %v4959_v31, %v627_v57  ;;  %v3557_v60 = vpop.f32.mrb[17].mxu0  ;;  %3633 = vmatprep.subr.bf16.mxu0 %v4218_v50  ;;  %v5753_v57 = vmov 0 }
 0x1b9   : > { %v948_v62 = vshll.u32 %v888_v56, 16  ;;  %v630_v63 = vpop.f32.mrb[18].mxu0  ;;  %3698 = vmatpush3.bf16.msra.mxu1 %v4217_v43  ;;  %v1355_v14 = vrot.slane %v888_v56, 1  ;;  %v946_v15 = vshrl.u32 %v888_v56, 16  ;;  %v4228_v60 = vld [vmem:[#allocation7 + $0x30] sm:$0xff]  }
 0x1ba   : > { %v722_v1 = vmax.f32 %v628_v27, 0.0  ;;  %v3558_v2 = vpop.f32.mrb[19].mxu0  ;;  %3699 = vmatprep.subr.bf16.mxu1 %v4219_v55  ;;  %v631_v4 = vadd.f32 %v4959_v31, %v630_v63 }
 0x1bb   : > { %3634 = vmatpush3.bf16.msra.mxu0 %v4218_v50  ;;  %v950_v8 = vrot.slane %v948_v62, 1  ;;  %v4227_v50 = vld [vmem:[#allocation7 + $0xf0] sm:$0xff]  }
 0x1bc   : > { %v862_v28 = vsel %vm832_vm7, %v722_v1, 0.0  ;;  %3635 = vmatprep.subr.bf16.mxu0 %v4220_v61  ;;  %v723_v16 = vmax.f32 %v631_v4, 0.0  ;;  %vm762_vm7 = vcmp.ge.s32.totalorder %v748_v0, 1 }
 0x1bd   : > { %v889_v7 = vpack.c.bf16 %v862_v28, %v862_v28  ;;  %3700 = vmatpush3.bf16.msra.mxu1 %v4219_v55  ;;  %v951_v25 = vor.u32 %v950_v8, %v946_v15  ;;  %vm5093_vm9 = vmand %vm762_vm7, %vm772_vm8  ;;  %v5755_v8 = vmov 0 }
 0x1be   : > { %3701 = vmatprep.subr.bf16.mxu1 %v4221_v3  ;;  %v863_v38 = vsel %vm5068_vm15, %v723_v16, 0.0  ;;  %v5754_v57 = vsel %vm5093_vm9, 4294967295, %v5753_v57  ;;  %vm838_vm7 = vmand %vm5093_vm9, %vm5706_vm6 }
 0x1bf   : > { %v953_v11 = vshll.u32 %v889_v7, 16  ;;  %v1356_v12 = vrot.slane %v889_v7, 1  ;;  %v635_v13 = vpop.f32.mrb[20].mxu0  ;;  %3636 = vmatpush3.bf16.msra.mxu0 %v4220_v61 }
 0x1c0   : > { %v636_v18 = vadd.f32 %v4959_v31, %v635_v13  ;;  %v3561_v19 = vpop.f32.mrb[21].mxu0  ;;  %3637 = vmatprep.subr.bf16.mxu0 %v4222_v5  ;;  %v4230_v13 = vld [vmem:[#allocation7 + $0x38] sm:$0xff]  }
 0x1c1   : > { %v955_v21 = vrot.slane %v953_v11, 1  ;;  %v638_v23 = vpop.f32.mrb[22].mxu0  ;;  %v5073_v24 = vsel %vm5703_vm11, %v1355_v14, %v1356_v12  ;;  %3702 = vmatpush3.bf16.msra.mxu1 %v4221_v3  ;;  %v5120_v19 = vld [vmem:[#allocation7 + $0x100] sm:$0xff]  }
 0x1c2   : > { %v724_v32 = vmax.f32 %v636_v18, 0.0  ;;  %v639_v33 = vadd.f32 %v4959_v31, %v638_v23  ;;  %v3562_v35 = vpop.f32.mrb[23].mxu0  ;;  %3683 = vmatprep.mubr.bf16.mxu1 %v5073_v24  ;;  %3703 = vmatprep.subr.bf16.mxu1 %v4223_v10  ;;  %v749_v23 = vadd.s32 5, %v4952_v29 }
 0x1c3   : > { %v5083_v37 = vsel %vm5702_vm12, %v951_v25, %v955_v21  ;;  %3638 = vmatpush3.bf16.msra.mxu0 %v4222_v5  ;;  %v4229_v5 = vld [vmem:[#allocation7 + $0xf8] sm:$0xff]  }
 0x1c4   : > { %v864_v39 = vsel %vm5059_vm14, %v724_v32, 0.0  ;;  %v5089_v42 = vpack.c.bf16 %v724_v32, %v723_v16  ;;  %v725_v43 = vmax.f32 %v639_v33, 0.0  ;;  %3619 = vmatprep.mubr.bf16.mxu0 %v5083_v37  ;;  %3639 = vmatprep.subr.bf16.mxu0 %v4224_v20  ;;  %vm763_vm8 = vcmp.ge.s32.totalorder %v749_v23, 1 }
 0x1c5   : > { %v890_v48 = vpack.c.bf16 %v864_v39, %v863_v38  ;;  %3704 = vmatpush3.bf16.msra.mxu1 %v4223_v10 }
 0x1c6   : > { %v865_v49 = vsel %vm835_vm0, %v725_v43, 0.0  ;;  %3705 = vmatprep.subr.bf16.mxu1 %v4225_v36  ;;  %vm5102_vm0 = vmand %vm5093_vm9, %vm5704_vm4 }
 0x1c7   : > { %v960_v52 = vshll.u32 %v890_v48, 16  ;;  %v891_v53 = vpack.c.bf16 %v865_v49, %v865_v49  ;;  %v643_v55 = vpop.f32.mrb[24].mxu0  ;;  %3640 = vmatpush3.bf16.msra.mxu0 %v4224_v20  ;;  %v1358_v27 = vrot.slane %v890_v48, 1  ;;  %v958_v1 = vshrl.u32 %v890_v48, 16 }
 0x1c8   : > { %v644_v56 = vadd.f32 %v4959_v31, %v643_v55  ;;  %v3565_v58 = vpop.f32.mrb[25].mxu0  ;;  %3641 = vmatprep.subr.bf16.mxu0 %v4226_v44  ;;  %v5756_v8 = vsel %vm5102_vm0, 4294967295, %v5755_v8  ;;  %v5757_v48 = vmov 0 }
 0x1c9   : > { %v965_v61 = vshll.u32 %v891_v53, 16  ;;  %v1359_v62 = vrot.slane %v891_v53, 1  ;;  %v646_v63 = vpop.f32.mrb[26].mxu0  ;;  %v962_v2 = vrot.slane %v960_v52, 1  ;;  %3706 = vmatpush3.bf16.msra.mxu1 %v4225_v36 }
 0x1ca   : > { %v726_v3 = vmax.f32 %v644_v56, 0.0  ;;  %v647_v28 = vadd.f32 %v4959_v31, %v646_v63  ;;  %v3566_v4 = vpop.f32.mrb[27].mxu0  ;;  %3707 = vmatprep.subr.bf16.mxu1 %v4227_v50 }
 0x1cb   : > { %v967_v7 = vrot.slane %v965_v61, 1  ;;  %v5107_v10 = vsel %vm5703_vm11, %v1358_v27, %v1359_v62  ;;  %v963_v11 = vor.u32 %v962_v2, %v958_v1  ;;  %3642 = vmatpush3.bf16.msra.mxu0 %v4226_v44  ;;  %v5759_v61 = vmov 0 }
 0x1cc   : > { %v727_v12 = vmax.f32 %v647_v28, 0.0  ;;  %3684 = vmatmul.mubr.bf16.gmra.mrb[4].mxu1 %v5107_v10  ;;  %3643 = vmatprep.subr.bf16.mxu0 %v4228_v60  ;;  %v866_v15 = vsel %vm5102_vm0, %v726_v3, 0.0  ;;  %v750_v2 = vadd.s32 6, %v4952_v29 }
 0x1cd   : > { %v5111_v14 = vsel %vm5702_vm12, %v963_v11, %v967_v7  ;;  %3708 = vmatpush3.bf16.msra.mxu1 %v4227_v50  ;;  %vm773_vm12 = vcmp.le.s32.totalorder %v749_v23, 16 }
 0x1ce   : > { %v867_v16 = vsel %vm5093_vm9, %v727_v12, 0.0  ;;  %v5117_v18 = vpack.c.bf16 %v727_v12, %v726_v3  ;;  %3620 = vmatmul.mubr.bf16.gmra.mrb[64].mxu0 %v5111_v14  ;;  %3709 = vmatprep.subr.bf16.mxu1 %v4229_v5  ;;  %vm5130_vm11 = vmand %vm763_vm8, %vm773_vm12  ;;  %vm5761_vm12 = vcmask 1046528   ;;  %vm774_vm9 = vcmp.le.s32.totalorder %v750_v2, 16 }
 0x1cf   : > { %v892_v20 = vpack.c.bf16 %v867_v16, %v866_v15  ;;  %v651_v21 = vpop.f32.mrb[28].mxu0  ;;  %3644 = vmatpush3.bf16.msra.mxu0 %v4228_v60  ;;  %v5758_v48 = vsel %vm5130_vm11, 4294967295, %v5757_v48  ;;  %vm841_vm8 = vmand %vm5130_vm11, %vm5706_vm6  ;;  %vm5769_vm6 = vsmask.f32 7424 }
 0x1d0   : > { %v652_v25 = vadd.f32 %v4959_v31, %v651_v21  ;;  %v3569_v0 = vpop.f32.mrb[29].mxu0  ;;  %3645 = vmatprep.subr.bf16.mxu0 %v4230_v13 }
 0x1d1   : > { %v972_v32 = vshll.u32 %v892_v20, 16  ;;  %v654_v33 = vpop.f32.mrb[30].mxu0  ;;  %3710 = vmatpush3.bf16.msra.mxu1 %v4229_v5  ;;  %v1361_v53 = vrot.slane %v892_v20, 1  ;;  %v970_v55 = vshrl.u32 %v892_v20, 16  ;;  %v5763_v0 = vmov 0 }
 0x1d2   : > { %v728_v35 = vmax.f32 %v652_v25, 0.0  ;;  %v3570_v36 = vpop.f32.mrb[31].mxu0  ;;  %3727 = vmatprep.subr.bf16.mxu1 %v5120_v19  ;;  %v655_v39 = vadd.f32 %v4959_v31, %v654_v33 }
 0x1d3   : > { %3646 = vmatpush3.bf16.msra.mxu0 %v4230_v13  ;;  %v974_v44 = vrot.slane %v972_v32, 1 }
 0x1d4   : > { %v868_v38 = vsel %vm838_vm7, %v728_v35, 0.0  ;;  %v729_v56 = vmax.f32 %v655_v39, 0.0  ;;  %vm5139_vm7 = vmand %vm5130_vm11, %vm5704_vm4  ;;  %vm5762_vm4 = vsmask.f32 7424 }
 0x1d5   : > { %v893_v43 = vpack.c.bf16 %v868_v38, %v868_v38  ;;  %v5760_v61 = vsel %vm5139_vm7, 4294967295, %v5759_v61  ;;  %v975_v1 = vor.u32 %v974_v44, %v970_v55 }
 0x1d6   : > { %v869_v7 = vsel %vm5139_vm7, %v729_v56, 0.0 }
 0x1d7   : > { %v977_v49 = vshll.u32 %v893_v43, 16  ;;  %v1362_v50 = vrot.slane %v893_v43, 1  ;;  %v659_v52 = vpop.f32.mrb[32].mxu0 }
 0x1d8   : > { %v660_v58 = vadd.f32 %v4959_v31, %v659_v52  ;;  %v3573_v27 = vpop.f32.mrb[33].mxu0 }
 0x1d9   : > { %v979_v60 = vrot.slane %v977_v49, 1  ;;  %v662_v62 = vpop.f32.mrb[34].mxu0  ;;  %v5144_v63 = vsel %vm5761_vm12, %v1361_v53, %v1362_v50  ;;  %vm764_vm12 = vcmp.ge.s32.totalorder %v750_v2, 1  ;;  %v5766_v53 = vmov 0 }
 0x1da   : > { %v730_v3 = vmax.f32 %v660_v58, 0.0  ;;  %v663_v28 = vadd.f32 %v4959_v31, %v662_v62  ;;  %v3574_v4 = vpop.f32.mrb[35].mxu0  ;;  %3687 = vmatprep.mubr.bf16.mxu1 %v5144_v63 }
 0x1db   : > { %v5154_v5 = vsel %vm5762_vm4, %v975_v1, %v979_v60  ;;  %vm5164_vm4 = vmand %vm764_vm12, %vm774_vm9  ;;  %vm5768_vm12 = vcmask 1046528  }
 0x1dc   : > { %v870_v11 = vsel %vm5130_vm11, %v730_v3, 0.0  ;;  %v5160_v12 = vpack.c.bf16 %v730_v3, %v729_v56  ;;  %v731_v13 = vmax.f32 %v663_v28, 0.0  ;;  %3623 = vmatprep.mubr.bf16.mxu0 %v5154_v5  ;;  %v5764_v0 = vsel %vm5164_vm4, 4294967295, %v5763_v0 }
 0x1dd   : > { %v894_v15 = vpack.c.bf16 %v870_v11, %v869_v7  ;;  %v751_v28 = vadd.s32 7, %v4952_v29 }
 0x1de   : > { %v871_v16 = vsel %vm841_vm8, %v731_v13, 0.0  ;;  %vm5765_vm8 = vcmp.ge.s32.totalorder %v4954_v30, 1 }
 0x1df   : > { %v984_v20 = vshll.u32 %v894_v15, 16  ;;  %v895_v21 = vpack.c.bf16 %v871_v16, %v871_v16  ;;  %v667_v23 = vpop.f32.mrb[36].mxu0  ;;  %v1364_v33 = vrot.slane %v894_v15, 1  ;;  %v982_v39 = vshrl.u32 %v894_v15, 16  ;;  %vm5173_vm9 = vmand %vm5164_vm4, %vm5765_vm8 }
 0x1e0   : > { %v668_v25 = vadd.f32 %v4959_v31, %v667_v23  ;;  %v3577_v32 = vpop.f32.mrb[37].mxu0  ;;  %v5767_v53 = vsel %vm5173_vm9, 4294967295, %v5766_v53 }
 0x1e1   : > { %v989_v35 = vshll.u32 %v895_v21, 16  ;;  %v1365_v36 = vrot.slane %v895_v21, 1  ;;  %v670_v38 = vpop.f32.mrb[38].mxu0  ;;  %v986_v43 = vrot.slane %v984_v20, 1 }
 0x1e2   : > { %v732_v44 = vmax.f32 %v668_v25, 0.0  ;;  %v671_v49 = vadd.f32 %v4959_v31, %v670_v38  ;;  %v3578_v50 = vpop.f32.mrb[39].mxu0 }
 0x1e3   : > { %v991_v52 = vrot.slane %v989_v35, 1  ;;  %v5178_v55 = vsel %vm5768_vm12, %v1364_v33, %v1365_v36  ;;  %v987_v56 = vor.u32 %v986_v43, %v982_v39  ;;  %vm765_vm12 = vcmp.ge.s32.totalorder %v751_v28, 1 }
 0x1e4   : > { %v733_v58 = vmax.f32 %v671_v49, 0.0  ;;  %3688 = vmatmul.mubr.bf16.gmra.mrb[8].mxu1 %v5178_v55  ;;  %v872_v60 = vsel %vm5173_vm9, %v732_v44, 0.0  ;;  %vm775_vm9 = vcmp.le.s32.totalorder %v751_v28, 16  ;;  %v752_v33 = vadd.s32 8, %v4952_v29 }
 0x1e5   : > { %v5182_v27 = vsel %vm5769_vm6, %v987_v56, %v991_v52  ;;  %vm5770_vm6 = vcmp.le.s32.totalorder %v4971_v40, 16  ;;  %vm5198_vm11 = vmand %vm765_vm12, %vm775_vm9  ;;  %vm5777_vm12 = vcmp.le.s32.totalorder %v4971_v40, 16  ;;  %v4237_v56 = vld [vmem:[#allocation7 + $0x130] sm:$0xff]  }
 0x1e6   : > { %v873_v62 = vsel %vm5164_vm4, %v733_v58, 0.0  ;;  %v5188_v1 = vpack.c.bf16 %v733_v58, %v732_v44  ;;  %3624 = vmatmul.mubr.bf16.gmra.mrb[68].mxu0 %v5182_v27  ;;  %vm844_vm8 = vmand %vm5164_vm4, %vm5770_vm6  ;;  %vm5773_vm6 = vcmp.ge.s32.totalorder %v4954_v30, 1  ;;  %vm766_vm7 = vcmp.ge.s32.totalorder %v752_v33, 1 }
 0x1e7   : > { %v896_v2 = vpack.c.bf16 %v873_v62, %v872_v60  ;;  %v675_v3 = vpop.f32.mrb[40].mxu0  ;;  %vm5208_vm9 = vmand %vm5198_vm11, %vm5773_vm6  ;;  %vm5778_vm6 = vsmask.f32 7424  ;;  %vm776_vm0 = vcmp.le.s32.totalorder %v752_v33, 16 }
 0x1e8   : > { %v676_v4 = vadd.f32 %v4959_v31, %v675_v3  ;;  %v3581_v7 = vpop.f32.mrb[41].mxu0  ;;  %vm847_vm4 = vmand %vm5198_vm11, %vm5777_vm12  ;;  %vm5781_vm12 = vcmp.ge.s32.totalorder %v4954_v30, 1 }
 0x1e9   : > { %v996_v11 = vshll.u32 %v896_v2, 16  ;;  %v678_v13 = vpop.f32.mrb[42].mxu0  ;;  %v1367_v39 = vrot.slane %v896_v2, 1  ;;  %v994_v43 = vshrl.u32 %v896_v2, 16 }
 0x1ea   : > { %v734_v15 = vmax.f32 %v676_v4, 0.0  ;;  %v3582_v16 = vpop.f32.mrb[43].mxu0  ;;  %v679_v21 = vadd.f32 %v4959_v31, %v678_v13 }
 0x1eb   : > { %v998_v25 = vrot.slane %v996_v11, 1 }
 0x1ec   : > { %v874_v20 = vsel %vm844_vm8, %v734_v15, 0.0  ;;  %v735_v44 = vmax.f32 %v679_v21, 0.0  ;;  %vm5776_vm8 = vcmask 1046528   ;;  %v4274_v21 = vld [vmem:[#allocation8 + $0x18] sm:$0xff]  }
 0x1ed   : > { %v897_v23 = vpack.c.bf16 %v874_v20, %v874_v20  ;;  %v999_v62 = vor.u32 %v998_v25, %v994_v43 }
 0x1ee   : > { %v875_v7 = vsel %vm5208_vm9, %v735_v44, 0.0 }
 0x1ef   : > { %v1001_v35 = vshll.u32 %v897_v23, 16  ;;  %v1368_v36 = vrot.slane %v897_v23, 1  ;;  %v683_v38 = vpop.f32.mrb[44].mxu0 }
 0x1f0   : > { %v684_v49 = vadd.f32 %v4959_v31, %v683_v38  ;;  %v3585_v50 = vpop.f32.mrb[45].mxu0 }
 0x1f1   : > { %v1003_v52 = vrot.slane %v1001_v35, 1  ;;  %v686_v58 = vpop.f32.mrb[46].mxu0  ;;  %v5213_v60 = vsel %vm5776_vm8, %v1367_v39, %v1368_v36  ;;  %vm5231_vm8 = vmand %vm766_vm7, %vm776_vm0  ;;  %vm5784_vm7 = vcmask 1046528   ;;  %v4263_v50 = vld [vmem:[#allocation7 + $0x200] sm:$0xff]  }
 0x1f2   : > { %v736_v3 = vmax.f32 %v684_v49, 0.0  ;;  %v687_v2 = vadd.f32 %v4959_v31, %v686_v58  ;;  %v3586_v28 = vpop.f32.mrb[47].mxu0  ;;  %3691 = vmatprep.mubr.bf16.mxu1 %v5213_v60  ;;  %vm3192_vm0 = vmpackc.low %vm4995_vm10, %vm5004_vm13  ;;  %vm5796_vm10 = vnez %v5756_v8  ;;  %vm5797_vm13 = vnez %v5754_v57  ;;  %v4234_v8 = vld [vmem:[#allocation7 + $0x118] sm:$0xff]  }
 0x1f3   : > { %v5222_v4 = vsel %vm5778_vm6, %v999_v62, %v1003_v52  ;;  %vm3189_vm6 = vmpackc.low %vm4964_vm3, %vm4977_vm5  ;;  %vm5788_vm5 = vcmp.le.s32.totalorder %v4971_v40, 16 }
 0x1f4   : > { %v876_v11 = vsel %vm5198_vm11, %v736_v3, 0.0  ;;  %v5228_v13 = vpack.c.bf16 %v736_v3, %v735_v44  ;;  %v737_v15 = vmax.f32 %v687_v2, 0.0  ;;  %3627 = vmatprep.mubr.bf16.mxu0 %v5222_v4  ;;  %vm5279_vm3 = vmpackc.low %vm5023_vm1, %vm5032_vm2 }
 0x1f5   : > { %v898_v16 = vpack.c.bf16 %v876_v11, %v875_v7  ;;  %vm5292_vm1 = vmpackc.low %vm5059_vm14, %vm5068_vm15  ;;  %vm5793_vm14 = vcmp.ge.s32.totalorder %v4954_v30, 1 }
 0x1f6   : > { %v877_v20 = vsel %vm847_vm4, %v737_v15, 0.0  ;;  %vm5240_vm4 = vmand %vm5231_vm8, %vm5781_vm12  ;;  %vm5785_vm12 = vsmask.f32 7424 }
 0x1f7   : > { %v1008_v23 = vshll.u32 %v898_v16, 16  ;;  %v899_v25 = vpack.c.bf16 %v877_v20, %v877_v20  ;;  %v691_v33 = vpop.f32.mrb[48].mxu0  ;;  %v1370_v35 = vrot.slane %v898_v16, 1  ;;  %v1006_v44 = vshrl.u32 %v898_v16, 16 }
 0x1f8   : > { %v692_v36 = vadd.f32 %v4959_v31, %v691_v33  ;;  %v3589_v38 = vpop.f32.mrb[49].mxu0  ;;  %v753_v20 = vadd.s32 9, %v4952_v29  ;;  %v4258_v33 = vld [vmem:[#allocation7 + $0x1d8] sm:$0xff]  }
 0x1f9   : > { %v1013_v39 = vshll.u32 %v899_v25, 16  ;;  %v1371_v43 = vrot.slane %v899_v25, 1  ;;  %v1010_v49 = vrot.slane %v1008_v23, 1  ;;  %v694_v52 = vpop.f32.mrb[50].mxu0 }
 0x1fa   : > { %v738_v58 = vmax.f32 %v692_v36, 0.0  ;;  %v695_v62 = vadd.f32 %v4959_v31, %v694_v52  ;;  %v3590_v3 = vpop.f32.mrb[51].mxu0 }
 0x1fb   : > { %v1015_v2 = vrot.slane %v1013_v39, 1  ;;  %v5250_v28 = vsel %vm5784_vm7, %v1370_v35, %v1371_v43  ;;  %v1011_v7 = vor.u32 %v1010_v49, %v1006_v44  ;;  %vm850_vm7 = vmand %vm5231_vm8, %vm5788_vm5  ;;  %vm5800_vm5 = vcmask 1046528  }
 0x1fc   : > { %3692 = vmatmul.mubr.bf16.gmra.mrb[12].mxu1 %v5250_v28  ;;  %v878_v11 = vsel %vm5240_vm4, %v738_v58, 0.0  ;;  %v739_v15 = vmax.f32 %v695_v62, 0.0  ;;  %v4233_v62 = vld [vmem:[#allocation7 + $0x110] sm:$0xff]  }
 0x1fd   : > { %3711 = vmatprep.mubr.msk.bf16.mxu1 %vm3192_vm0, %v5020_v17  ;;  %v5266_v16 = vsel %vm5785_vm12, %v1011_v7, %v1015_v2  ;;  %vm777_vm12 = vcmp.le.s32.totalorder %v753_v20, 16  ;;  %v4264_v7 = vld [vmem:[#allocation7 + $0x208] sm:$0xff]  }
 0x1fe   : > { %3628 = vmatmul.mubr.bf16.gmra.mrb[72].mxu0 %v5266_v16  ;;  %v879_v34 = vsel %vm5231_vm8, %v739_v15, 0.0  ;;  %v5272_v41 = vpack.c.bf16 %v739_v15, %v738_v58  ;;  %v4267_v15 = vld [vmem:[#allocation7 + $0x220] sm:$0xff]  }
 0x1ff   : > { %3647 = vmatprep.mubr.msk.bf16.mxu0 %vm3189_vm6, %v4985_v45  ;;  %v900_v23 = vpack.c.bf16 %v879_v34, %v878_v11  ;;  %v699_v25 = vpop.f32.mrb[52].mxu0  ;;  %vm767_vm6 = vcmp.ge.s32.totalorder %v753_v20, 1 }
 0x200   : > { %v700_v29 = vadd.f32 %v4959_v31, %v699_v25  ;;  %v3593_v35 = vpop.f32.mrb[53].mxu0  ;;  %vm5300_vm2 = vmand %vm767_vm6, %vm777_vm12  ;;  %vm5802_vm6 = vnez %v5758_v48 }
 0x201   : > { %v1740_v36 = vshll.u32 %v900_v23, 16  ;;  %v702_v45 = vpop.f32.mrb[54].mxu0  ;;  %v1738_v44 = vshrl.u32 %v900_v23, 16  ;;  %v1930_v58 = vrot.slane %v900_v23, 1  ;;  %vm5321_vm15 = vmand %vm5300_vm2, %vm5793_vm14  ;;  %vm5805_vm14 = vcmp.le.s32.totalorder %v4971_v40, 16  ;;  %v4235_v40 = vld [vmem:[#allocation7 + $0x120] sm:$0xff]  }
 0x202   : > { %v740_v38 = vmax.f32 %v700_v29, 0.0  ;;  %v703_v39 = vadd.f32 %v4959_v31, %v702_v45  ;;  %v3594_v43 = vpop.f32.mrb[55].mxu0  ;;  %v4270_v23 = vld [vmem:[#allocation7 + $0x238] sm:$0xff]  }
 0x203   : > { %v1742_v49 = vrot.slane %v1740_v36, 1 }
 0x204   : > { %3712 = vmatmul.mubr.msk.bf16.vlgmr.msra.gmra.mrb[0].mxu1 %vm5279_vm3, %v5048_v54  ;;  %v880_v52 = vsel %vm850_vm7, %v740_v38, 0.0  ;;  %v741_v3 = vmax.f32 %v703_v39, 0.0  ;;  %vm5801_vm7 = vnez %v5760_v61 }
 0x205   : > { %3728 = vmatpush3.bf16.msra.mxu1 %v5120_v19  ;;  %3715 = vmatprep.mubr.msk.bf16.mxu1 %vm5292_vm1, %v5089_v42  ;;  %v901_v9 = vpack.c.bf16 %v880_v52, %v880_v52  ;;  %v1743_v6 = vor.u32 %v1742_v49, %v1738_v44  ;;  %vm5341_vm12 = vmpackc.low %vm5802_vm6, %vm5801_vm7  ;;  %vm5808_vm7 = vnez %v5764_v0 }
 0x206   : > { %3648 = vmatmul.mubr.msk.bf16.vlgmr.msra.gmra.mrb[60].mxu0 %vm3192_vm0, %v5020_v17  ;;  %3729 = vmatprep.subr.bf16.mxu1 %v4232_v46  ;;  %vm5330_vm0 = vmpackc.low %vm5797_vm13, %vm5796_vm10  ;;  %v881_v57 = vsel %vm5321_vm15, %v741_v3, 0.0  ;;  %vm5806_vm13 = vsmask.f32 7424 }
 0x207   : > { %3651 = vmatprep.mubr.msk.bf16.mxu0 %vm5279_vm3, %v5048_v54  ;;  %v1745_v19 = vshll.u32 %v901_v9, 16  ;;  %v1931_v2 = vrot.slane %v901_v9, 1  ;;  %v707_v59 = vpop.f32.mrb[56].mxu0  ;;  %vm853_vm10 = vmand %vm5300_vm2, %vm5805_vm14 }
 0x208   : > { %v708_v17 = vadd.f32 %v4959_v31, %v707_v59  ;;  %v3597_v11 = vpop.f32.mrb[57].mxu0  ;;  %vm5383_vm14 = vmpackc.low %vm5198_vm11, %vm5208_vm9  ;;  %v4239_v59 = vld [vmem:[#allocation7 + $0x140] sm:$0xff]  }
 0x209   : > { %3730 = vmatpush3.bf16.msra.mxu1 %v4232_v46  ;;  %v1747_v30 = vrot.slane %v1745_v19, 1  ;;  %v710_v20 = vpop.f32.mrb[58].mxu0  ;;  %v5335_v34 = vsel %vm5800_vm5, %v1930_v58, %v1931_v2  ;;  %vm5807_vm5 = vnez %v5767_v53  ;;  %vm3250_vm11 = vmpackc.low %vm5231_vm8, %vm5240_vm4  ;;  %v4238_v2 = vld [vmem:[#allocation7 + $0x138] sm:$0xff]  }
 0x20a   : > { %3731 = vmatprep.subr.bf16.mxu1 %v4233_v62  ;;  %v742_v25 = vmax.f32 %v708_v17, 0.0  ;;  %v711_v29 = vadd.f32 %v4959_v31, %v710_v20  ;;  %v3598_v35 = vpop.f32.mrb[59].mxu0  ;;  %vm5375_vm6 = vmpackc.low %vm5808_vm7, %vm5807_vm5  ;;  %v4241_v17 = vld [vmem:[#allocation7 + $0x150] sm:$0xff]   ;;  %v4242_v11 = vld [vmem:[#allocation7 + $0x158] sm:$0xff]  }
 0x20b   : > { %v5353_v61 = vsel %vm5806_vm13, %v1743_v6, %v1747_v30  ;;  %v4240_v6 = vld [vmem:[#allocation7 + $0x148] sm:$0xff]   ;;  %v4245_v20 = vld [vmem:[#allocation7 + $0x170] sm:$0xff]   ;;  %v4250_v35 = vld [vmem:[#allocation7 + $0x198] sm:$0xff]  }
 0x20c   : > { %3716 = vmatmul.mubr.msk.bf16.gmra.mrb[4].mxu1 %vm5330_vm0, %v5117_v18  ;;  %v882_v48 = vsel %vm5300_vm2, %v742_v25, 0.0  ;;  %v5360_v36 = vpack.c.bf16 %v742_v25, %v741_v3  ;;  %v743_v45 = vmax.f32 %v711_v29, 0.0  ;;  %v4236_v3 = vld [vmem:[#allocation7 + $0x128] sm:$0xff]   ;;  %v4249_v29 = vld [vmem:[#allocation7 + $0x190] sm:$0xff]   ;;  %vm3298_vm9 = vmpackc.low %vm5300_vm2, %vm5321_vm15 }
 0x20d   : > { %3732 = vmatpush3.bf16.msra.mxu1 %v4233_v62  ;;  %3719 = vmatprep.mubr.msk.bf16.mxu1 %vm5341_vm12, %v5160_v12  ;;  %v902_v31 = vpack.c.bf16 %v882_v48, %v881_v57  ;;  %v4244_v30 = vld [vmem:[#allocation7 + $0x168] sm:$0xff]   ;;  %v4247_v57 = vld [vmem:[#allocation7 + $0x180] sm:$0xff]  }
 0x20e   : > { %3652 = vmatmul.mubr.msk.bf16.gmra.mrb[64].mxu0 %vm5292_vm1, %v5089_v42  ;;  %3733 = vmatprep.subr.bf16.mxu1 %v4234_v8  ;;  %v883_v46 = vsel %vm853_vm10, %v743_v45, 0.0  ;;  %vm5813_vm10 = vcmask 1046528   ;;  %v4248_v25 = vld [vmem:[#allocation7 + $0x188] sm:$0xff]   ;;  %v4253_v45 = vld [vmem:[#allocation7 + $0x1b0] sm:$0xff]  }
 0x20f   : > { %3655 = vmatprep.mubr.msk.bf16.mxu0 %vm5330_vm0, %v5117_v18  ;;  %v2293_v38 = vshll.u32 %v902_v31, 16  ;;  %v903_v39 = vpack.c.bf16 %v883_v46, %v883_v46  ;;  %v2291_v43 = vshrl.u32 %v902_v31, 16  ;;  %v2483_v44 = vrot.slane %v902_v31, 1  ;;  %v4252_v48 = vld [vmem:[#allocation7 + $0x1a8] sm:$0xff]   ;;  %v4254_v31 = vld [vmem:[#allocation7 + $0x1b8] sm:$0xff]   ;;  %vm5815_vm8 = vmmov %vm5813_vm10 }
 0x210   : > { %v4256_v46 = vld [vmem:[#allocation7 + $0x1c8] sm:$0xff]   ;;  %vm5816_vm4 = vmmov %vm5815_vm8 }
 0x211   : > { %3734 = vmatpush3.bf16.msra.mxu1 %v4234_v8  ;;  %v2298_v52 = vshll.u32 %v903_v39, 16  ;;  %v2484_v9 = vrot.slane %v903_v39, 1  ;;  %v2295_v58 = vrot.slane %v2293_v38, 1  ;;  %v4246_v8 = vld [vmem:[#allocation7 + $0x178] sm:$0xff]   ;;  %v4257_v38 = vld [vmem:[#allocation7 + $0x1d0] sm:$0xff]  }
 0x212   : > { %3735 = vmatprep.subr.bf16.mxu1 %v4235_v40 }
 0x213   : > { %v2300_v53 = vrot.slane %v2298_v52, 1  ;;  %v2296_v19 = vor.u32 %v2295_v58, %v2291_v43  ;;  %v5388_v0 = vsel %vm5813_vm10, %v2483_v44, %v2484_v9  ;;  %v4276_v52 = vld [vmem:[#allocation8 + $0x28] sm:$0xff]   ;;  %v4277_v9 = vld [vmem:[#allocation8 + $0x30] sm:$0xff]   ;;  %v4278_v58 = vld [vmem:[#allocation8 + $0x38] sm:$0xff]  }
 0x214   : > { %3720 = vmatmul.mubr.msk.bf16.gmra.mrb[8].mxu1 %vm5375_vm6, %v5188_v1 }
 0x215   : > { %3736 = vmatpush3.bf16.msra.mxu1 %v4235_v40  ;;  %3723 = vmatprep.mubr.msk.bf16.mxu1 %vm5383_vm14, %v5228_v13  ;;  %v5397_v32 = vsel %vm5806_vm13, %v2296_v19, %v2300_v53  ;;  %v4255_v40 = vld [vmem:[#allocation7 + $0x1c0] sm:$0xff]  }
 0x216   : > { %3656 = vmatmul.mubr.msk.bf16.gmra.mrb[68].mxu0 %vm5341_vm12, %v5160_v12  ;;  %3737 = vmatprep.subr.bf16.mxu1 %v4236_v3 }
 0x217   : > { %3659 = vmatprep.mubr.msk.bf16.mxu0 %vm5375_vm6, %v5188_v1 }
 0x219   : > { %3738 = vmatpush3.bf16.msra.mxu1 %v4236_v3  ;;  %v5490_v3 = vld [vmem:[%s5814_s24] ss:$0 sm:$0xff]  ;;  %s5612_s24 = scalar_lea.hbm %s5835_s25, %s3331_s30 }
 0x21a   : > { %3739 = vmatprep.subr.bf16.mxu1 %v4237_v56 }
 0x21c   : > { %3724 = vmatmul.mubr.msk.bf16.gmra.mrb[12].mxu1 %vm3250_vm11, %v5272_v41 }
 0x21d   : > { %3740 = vmatpush3.bf16.msra.mxu1 %v4237_v56  ;;  %3743 = vmatprep.mubr.bf16.mxu1 %v5041_v51  ;;  %v4243_v51 = vld [vmem:[#allocation7 + $0x160] sm:$0xff]  }
 0x21e   : > { %3660 = vmatmul.mubr.msk.bf16.gmra.mrb[72].mxu0 %vm5383_vm14, %v5228_v13  ;;  %3741 = vmatprep.subr.bf16.mxu1 %v4238_v2 }
 0x221   : > { %3742 = vmatpush3.bf16.msra.mxu1 %v4238_v2 }
 0x222   : > { %3759 = vmatprep.subr.bf16.mxu1 %v4239_v59 }
 0x224   : > { %3744 = vmatmul.mubr.bf16.vlgmr.msra.gmra.mrb[0].mxu1 %v5083_v37 }
 0x225   : > { %3760 = vmatpush3.bf16.msra.mxu1 %v4239_v59  ;;  %3747 = vmatprep.mubr.bf16.mxu1 %v5111_v14 }
 0x226   : > { %3761 = vmatprep.subr.bf16.mxu1 %v4240_v6 }
 0x229   : > { %3762 = vmatpush3.bf16.msra.mxu1 %v4240_v6 }
 0x22a   : > { %3763 = vmatprep.subr.bf16.mxu1 %v4241_v17 }
 0x22c   : > { %3748 = vmatmul.mubr.bf16.gmra.mrb[4].mxu1 %v5154_v5 }
 0x22d   : > { %3764 = vmatpush3.bf16.msra.mxu1 %v4241_v17  ;;  %3751 = vmatprep.mubr.bf16.mxu1 %v5182_v27 }
 0x22e   : > { %3765 = vmatprep.subr.bf16.mxu1 %v4242_v11 }
 0x231   : > { %3766 = vmatpush3.bf16.msra.mxu1 %v4242_v11 }
 0x232   : > { %3767 = vmatprep.subr.bf16.mxu1 %v4243_v51 }
 0x234   : > { %3752 = vmatmul.mubr.bf16.gmra.mrb[8].mxu1 %v5222_v4 }
 0x235   : > { %3768 = vmatpush3.bf16.msra.mxu1 %v4243_v51  ;;  %3755 = vmatprep.mubr.bf16.mxu1 %v5266_v16 }
 0x236   : > { %3769 = vmatprep.subr.bf16.mxu1 %v4244_v30 }
 0x239   : > { %3770 = vmatpush3.bf16.msra.mxu1 %v4244_v30 }
 0x23a   : > { %3771 = vmatprep.subr.bf16.mxu1 %v4245_v20 }
 0x23c   : > { %3756 = vmatmul.mubr.bf16.gmra.mrb[12].mxu1 %v5353_v61 }
 0x23d   : > { %3772 = vmatpush3.bf16.msra.mxu1 %v4245_v20  ;;  %3775 = vmatprep.mubr.bf16.mxu1 %v5037_v47  ;;  %v4251_v47 = vld [vmem:[#allocation7 + $0x1a0] sm:$0xff]  }
 0x23e   : > { %3773 = vmatprep.subr.bf16.mxu1 %v4246_v8 }
 0x241   : > { %3774 = vmatpush3.bf16.msra.mxu1 %v4246_v8 }
 0x242   : > { %3791 = vmatprep.subr.bf16.mxu1 %v4247_v57 }
 0x244   : > { %3776 = vmatmul.mubr.bf16.vlgmr.msra.gmra.mrb[0].mxu1 %v5073_v24 }
 0x245   : > { %3792 = vmatpush3.bf16.msra.mxu1 %v4247_v57  ;;  %3779 = vmatprep.mubr.bf16.mxu1 %v5107_v10 }
 0x246   : > { %3793 = vmatprep.subr.bf16.mxu1 %v4248_v25 }
 0x249   : > { %3794 = vmatpush3.bf16.msra.mxu1 %v4248_v25 }
 0x24a   : > { %3795 = vmatprep.subr.bf16.mxu1 %v4249_v29 }
 0x24c   : > { %3780 = vmatmul.mubr.bf16.gmra.mrb[4].mxu1 %v5144_v63 }
 0x24d   : > { %3796 = vmatpush3.bf16.msra.mxu1 %v4249_v29  ;;  %3783 = vmatprep.mubr.bf16.mxu1 %v5178_v55 }
 0x24e   : > { %3797 = vmatprep.subr.bf16.mxu1 %v4250_v35 }
 0x251   : > { %3798 = vmatpush3.bf16.msra.mxu1 %v4250_v35 }
 0x252   : > { %3799 = vmatprep.subr.bf16.mxu1 %v4251_v47 }
 0x254   : > { %3784 = vmatmul.mubr.bf16.gmra.mrb[8].mxu1 %v5213_v60 }
 0x255   : > { %3800 = vmatpush3.bf16.msra.mxu1 %v4251_v47  ;;  %3787 = vmatprep.mubr.bf16.mxu1 %v5250_v28 }
 0x256   : > { %3801 = vmatprep.subr.bf16.mxu1 %v4252_v48 }
 0x259   : > { %3802 = vmatpush3.bf16.msra.mxu1 %v4252_v48 }
 0x25a   : > { %3803 = vmatprep.subr.bf16.mxu1 %v4253_v45 }
 0x25c   : > { %3788 = vmatmul.mubr.bf16.gmra.mrb[12].mxu1 %v5335_v34 }
 0x25d   : > { %3804 = vmatpush3.bf16.msra.mxu1 %v4253_v45  ;;  %3807 = vmatprep.mubr.msk.bf16.mxu1 %vm5279_vm3, %v5048_v54  ;;  %v4259_v54 = vld [vmem:[#allocation7 + $0x1e0] sm:$0xff]   ;;  %vm5817_vm3 = vmmov %vm5816_vm4 }
 0x25e   : > { %3805 = vmatprep.subr.bf16.mxu1 %v4254_v31 }
 0x261   : > { %3806 = vmatpush3.bf16.msra.mxu1 %v4254_v31 }
 0x262   : > { %3823 = vmatprep.subr.bf16.mxu1 %v4255_v40 }
 0x264   : > { %3808 = vmatmul.mubr.msk.bf16.vlgmr.msra.gmra.mrb[0].mxu1 %vm5292_vm1, %v5089_v42  ;;  %v4260_v42 = vld [vmem:[#allocation7 + $0x1e8] sm:$0xff]   ;;  %vm5818_vm1 = vmmov %vm5817_vm3 }
 0x265   : > { %3824 = vmatpush3.bf16.msra.mxu1 %v4255_v40  ;;  %3811 = vmatprep.mubr.msk.bf16.mxu1 %vm5330_vm0, %v5117_v18  ;;  %v4271_v18 = vld [vmem:[#allocation8] sm:$0xff]   ;;  %vm5820_vm2 = vmmov %vm5818_vm1 }
 0x266   : > { %3825 = vmatprep.subr.bf16.mxu1 %v4256_v46  ;;  %3887 = vmatprep.subr.bf16.mxu0 %v4271_v18  ;;  %vm5821_vm15 = vmmov %vm5818_vm1 }
 0x267   : > { %3888 = vmatpush3.bf16.msra.mxu0 %v4271_v18  ;;  %vm5822_vm0 = vmmov %vm5818_vm1 }
 0x268   : > { %3889 = vmatprep.subr.bf16.mxu0 %v4272_v26  ;;  %vm5825_vm5 = vmmov %vm5822_vm0 }
 0x269   : > { %3826 = vmatpush3.bf16.msra.mxu1 %v4256_v46  ;;  %vm5826_vm7 = vmmov %vm5822_vm0 }
 0x26a   : > { %3827 = vmatprep.subr.bf16.mxu1 %v4257_v38  ;;  %vm5829_vm10 = vmmov %vm5822_vm0 }
 0x26b   : > { %3890 = vmatpush3.bf16.msra.mxu0 %v4272_v26  ;;  %vm5831_vm13 = vmmov %vm5822_vm0 }
 0x26c   : > { %3812 = vmatmul.mubr.msk.bf16.gmra.mrb[4].mxu1 %vm5341_vm12, %v5160_v12  ;;  %v4261_v12 = vld [vmem:[#allocation7 + $0x1f0] sm:$0xff]   ;;  %vm5823_vm12 = vmmov %vm5822_vm0 }
 0x26d   : > { %3828 = vmatpush3.bf16.msra.mxu1 %v4257_v38  ;;  %3815 = vmatprep.mubr.msk.bf16.mxu1 %vm5375_vm6, %v5188_v1  ;;  %v4273_v1 = vld [vmem:[#allocation8 + $0x10] sm:$0xff]   ;;  %vm5827_vm6 = vmmov %vm5822_vm0 }
 0x26e   : > { %3829 = vmatprep.subr.bf16.mxu1 %v4258_v33  ;;  %3891 = vmatprep.subr.bf16.mxu0 %v4273_v1 }
 0x26f   : > { %3892 = vmatpush3.bf16.msra.mxu0 %v4273_v1 }
 0x270   : > { %3893 = vmatprep.subr.bf16.mxu0 %v4274_v21 }
 0x271   : > { %3830 = vmatpush3.bf16.msra.mxu1 %v4258_v33 }
 0x272   : > { %3831 = vmatprep.subr.bf16.mxu1 %v4259_v54 }
 0x273   : > { %3894 = vmatpush3.bf16.msra.mxu0 %v4274_v21 }
 0x274   : > { %3816 = vmatmul.mubr.msk.bf16.gmra.mrb[8].mxu1 %vm5383_vm14, %v5228_v13  ;;  %v4262_v13 = vld [vmem:[#allocation7 + $0x1f8] sm:$0xff]   ;;  %vm5828_vm14 = vmmov %vm5822_vm0 }
 0x275   : > { %3832 = vmatpush3.bf16.msra.mxu1 %v4259_v54  ;;  %3819 = vmatprep.mubr.msk.bf16.mxu1 %vm3250_vm11, %v5272_v41  ;;  %v4275_v41 = vld [vmem:[#allocation8 + $0x20] sm:$0xff]   ;;  %vm5832_vm11 = vmmov %vm5822_vm0 }
 0x276   : > { %3833 = vmatprep.subr.bf16.mxu1 %v4260_v42  ;;  %3895 = vmatprep.subr.bf16.mxu0 %v4275_v41 }
 0x277   : > { %3896 = vmatpush3.bf16.msra.mxu0 %v4275_v41 }
 0x278   : > { %3897 = vmatprep.subr.bf16.mxu0 %v4276_v52 }
 0x279   : > { %3834 = vmatpush3.bf16.msra.mxu1 %v4260_v42 }
 0x27a   : > { %3835 = vmatprep.subr.bf16.mxu1 %v4261_v12 }
 0x27b   : > { %3898 = vmatpush3.bf16.msra.mxu0 %v4276_v52 }
 0x27c   : > { %3820 = vmatmul.mubr.msk.bf16.gmra.mrb[12].mxu1 %vm3298_vm9, %v5360_v36  ;;  %3899 = vmatprep.subr.bf16.mxu0 %v4277_v9  ;;  %vm5833_vm9 = vmmov %vm5822_vm0 }
 0x27d   : > { %3836 = vmatpush3.bf16.msra.mxu1 %v4261_v12  ;;  %3839 = vmatprep.mubr.bf16.mxu1 %v5083_v37  ;;  %v4266_v37 = vld [vmem:[#allocation7 + $0x218] sm:$0xff]  }
 0x27e   : > { %3837 = vmatprep.subr.bf16.mxu1 %v4262_v13 }
 0x27f   : > { %3900 = vmatpush3.bf16.msra.mxu0 %v4277_v9 }
 0x280   : > { %3901 = vmatprep.subr.bf16.mxu0 %v4278_v58 }
 0x281   : > { %3838 = vmatpush3.bf16.msra.mxu1 %v4262_v13 }
 0x282   : > { %3855 = vmatprep.subr.bf16.mxu1 %v4263_v50 }
 0x283   : > { %3902 = vmatpush3.bf16.msra.mxu0 %v4278_v58 }
 0x284   : > { %3840 = vmatmul.mubr.bf16.vlgmr.msra.gmra.mrb[0].mxu1 %v5111_v14  ;;  %v4268_v14 = vld [vmem:[#allocation7 + $0x228] sm:$0xff]  }
 0x285   : > { %3856 = vmatpush3.bf16.msra.mxu1 %v4263_v50  ;;  %3843 = vmatprep.mubr.bf16.mxu1 %v5154_v5  ;;  %v4269_v5 = vld [vmem:[#allocation7 + $0x230] sm:$0xff]  }
 0x286   : > { %3857 = vmatprep.subr.bf16.mxu1 %v4264_v7 }
 0x289   : > { %3858 = vmatpush3.bf16.msra.mxu1 %v4264_v7 }
 0x28a   : > { %3859 = vmatprep.subr.bf16.mxu1 %v4265_v22 }
 0x28c   : > { %3844 = vmatmul.mubr.bf16.gmra.mrb[4].mxu1 %v5182_v27 }
 0x28d   : > { %3860 = vmatpush3.bf16.msra.mxu1 %v4265_v22  ;;  %3847 = vmatprep.mubr.bf16.mxu1 %v5222_v4 }
 0x28e   : > { %3861 = vmatprep.subr.bf16.mxu1 %v4266_v37 }
 0x291   : > { %3862 = vmatpush3.bf16.msra.mxu1 %v4266_v37 }
 0x292   : > { %3863 = vmatprep.subr.bf16.mxu1 %v4267_v15 }
 0x294   : > { %3848 = vmatmul.mubr.bf16.gmra.mrb[8].mxu1 %v5266_v16 }
 0x295   : > { %3864 = vmatpush3.bf16.msra.mxu1 %v4267_v15  ;;  %3851 = vmatprep.mubr.bf16.mxu1 %v5353_v61 }
 0x296   : > { %3865 = vmatprep.subr.bf16.mxu1 %v4268_v14 }
 0x299   : > { %3866 = vmatpush3.bf16.msra.mxu1 %v4268_v14 }
 0x29a   : > { %3867 = vmatprep.subr.bf16.mxu1 %v4269_v5 }
 0x29c   : > { %3852 = vmatmul.mubr.bf16.gmra.mrb[12].mxu1 %v5397_v32 }
 0x29d   : > { %3868 = vmatpush3.bf16.msra.mxu1 %v4269_v5  ;;  %3871 = vmatprep.mubr.bf16.mxu1 %v5073_v24 }
 0x29e   : > { %3869 = vmatprep.subr.bf16.mxu1 %v4270_v23 }
 0x2a1   : > { %3870 = vmatpush3.bf16.msra.mxu1 %v4270_v23 }
 0x2a4   : > { %3872 = vmatmul.mubr.bf16.vlgmr.msra.gmra.mrb[0].mxu1 %v5107_v10 }
 0x2a5   : > { %3875 = vmatprep.mubr.bf16.mxu1 %v5144_v63 }
 0x2ac   : > { %3876 = vmatmul.mubr.bf16.gmra.mrb[4].mxu1 %v5178_v55 }
 0x2ad   : > { %3879 = vmatprep.mubr.bf16.mxu1 %v5213_v60 }
 0x2b4   : > { %3880 = vmatmul.mubr.bf16.gmra.mrb[8].mxu1 %v5250_v28 }
 0x2b5   : > { %3883 = vmatprep.mubr.bf16.mxu1 %v5335_v34 }
 0x2bc   : > { %3884 = vmatmul.mubr.bf16.gmra.mrb[12].mxu1 %v5388_v0 }
 0x2d9   : > { %v3649_v27 = vpop.f32.mrb[60].mxu0 }
 0x2da   : > { %v1269_v4 = vpop.f32.mrb[61].mxu0 }
 0x2db   : > { %v3650_v16 = vpop.f32.mrb[62].mxu0 }
 0x2dc   : > { %v1272_v24 = vpop.f32.mrb[63].mxu0 }
 0x2e1   : > { %v3653_v61 = vpop.f32.mrb[64].mxu0 }
 0x2e2   : > { %v1285_v36 = vpop.f32.mrb[65].mxu0 }
 0x2e3   : > { %v3654_v39 = vpop.f32.mrb[66].mxu0 }
 0x2e4   : > { %v1288_v10 = vpop.f32.mrb[67].mxu0 }
 0x2e9   : > { %v3657_v43 = vpop.f32.mrb[68].mxu0 }
 0x2ea   : > { %v1301_v63 = vpop.f32.mrb[69].mxu0 }
 0x2eb   : > { %v3658_v44 = vpop.f32.mrb[70].mxu0 }
 0x2ec   : > { %v1304_v55 = vpop.f32.mrb[71].mxu0 }
 0x2f1   : > { %v5479_v49 = vpop.f32.mrb[72].mxu0 }
 0x2f2   : > { %v5481_v60 = vpop.f32.mrb[73].mxu0 }
 0x2f3   : > { %v5483_v28 = vpop.f32.mrb[74].mxu0 }
 0x2f4   : > { %v5485_v34 = vpop.f32.mrb[75].mxu0 }
 0x377   : > { %v3873_v62 = vpop.f32.mrb[0].mxu1 }
 0x378   : > { %v3919_v53 = vadd.f32 %v3873_v62, %v3649_v27  ;;  %v2586_v19 = vpop.f32.mrb[1].mxu1 }
 0x379   : > { %v3920_v0 = vadd.f32 %v2586_v19, %v1269_v4  ;;  %v3874_v32 = vpop.f32.mrb[2].mxu1 }
 0x37a   : > { %v2674_v56 = vadd.f32 %v3919_v53, %v5490_v3  ;;  %v3921_v2 = vadd.f32 %v3874_v32, %v3650_v16  ;;  %v2589_v59 = vpop.f32.mrb[3].mxu1 }
 0x37b   : > { %v2672_v6 = vadd.f32 %v3920_v0, %v5490_v3  ;;  %v3922_v17 = vadd.f32 %v2589_v59, %v1272_v24 }
 0x37c   : > { %v2675_v11 = vadd.f32 %v3921_v2, %v5490_v3  ;;  %v2690_v30 = vmax.f32 %v2674_v56, 0.0 }
 0x37d   : > { %v2673_v51 = vadd.f32 %v3922_v17, %v5490_v3  ;;  %v2688_v8 = vmax.f32 %v2672_v6, 0.0 }
 0x37e   : > { %v2691_v20 = vmax.f32 %v2675_v11, 0.0  ;;  %v4279_v11 = vld [vmem:[%s4883_s14 + $0x30] sm:$0xff] }
 0x37f   : > { %v2689_v57 = vmax.f32 %v2673_v51, 0.0  ;;  %v3877_v25 = vpop.f32.mrb[4].mxu1  ;;  %v4280_v51 = vld [vmem:[%s4883_s14 + $0x38] sm:$0xff] }
 0x380   : > { %v2705_v29 = vpack.c.bf16 %v2691_v20, %v2690_v30  ;;  %v3923_v35 = vadd.f32 %v3877_v25, %v3653_v61  ;;  %v2602_v47 = vpop.f32.mrb[5].mxu1  ;;  %v2911_v30 = vrot.slane %v4280_v51, 1  ;;  %v4281_v20 = vld [vmem:[%s4883_s14 + $0x40] sm:$0xff] }
 0x381   : > { %v3924_v48 = vadd.f32 %v2602_v47, %v1285_v36  ;;  %v3878_v45 = vpop.f32.mrb[6].mxu1  ;;  %v2704_v31 = vpack.c.bf16 %v2689_v57, %v2688_v8  ;;  %v4282_v25 = vld [vmem:[%s4883_s14 + $0x60] sm:$0xff] }
 0x382   : > { %v2678_v40 = vadd.f32 %v3923_v35, %v5490_v3  ;;  %v3925_v46 = vadd.f32 %v3878_v45, %v3654_v39  ;;  %v2605_v38 = vpop.f32.mrb[7].mxu1  ;;  %v4283_v35 = vld [vmem:[%s4883_s14 + $0x68] sm:$0xff] }
 0x383   : > { %v2676_v33 = vadd.f32 %v3924_v48, %v5490_v3  ;;  %v3926_v54 = vadd.f32 %v2605_v38, %v1288_v10  ;;  %3903 = vmatprep.mubr.bf16.mxu0 %v2704_v31  ;;  %v2921_v47 = vrot.slane %v4283_v35, 1  ;;  %v4284_v48 = vld [vmem:[%s4883_s14 + $0x70] sm:$0xff] }
 0x384   : > { %v2679_v42 = vadd.f32 %v3925_v46, %v5490_v3  ;;  %3904 = vmatmul.mubr.bf16.vlgmr.msra.gmra.mrb[76].mxu0 %v2705_v29  ;;  %v2694_v26 = vmax.f32 %v2678_v40, 0.0  ;;  %v2920_v29 = vrot.slane %v4282_v25, 1  ;;  %v2923_v45 = vrot.slane %v4284_v48, 1  ;;  %v4285_v46 = vld [vmem:[%s4883_s14 + $0x90] sm:$0xff] }
 0x385   : > { %v2677_v18 = vadd.f32 %v3926_v54, %v5490_v3  ;;  %v2692_v1 = vmax.f32 %v2676_v33, 0.0  ;;  %v2930_v38 = vrot.slane %v4285_v46, 1  ;;  %v4286_v33 = vld [vmem:[%s4883_s14 + $0x98] sm:$0xff] }
 0x386   : > { %v2695_v12 = vmax.f32 %v2679_v42, 0.0  ;;  %v2922_v31 = vsel %vm5817_vm3, %v2920_v29, %v2921_v47  ;;  %v5522_v40 = vsel %vm5818_vm1, %v2921_v47, %v2923_v45  ;;  %v2931_v54 = vrot.slane %v4286_v33, 1  ;;  %v4287_v42 = vld [vmem:[%s4883_s14 + $0xa0] sm:$0xff]  ;;  %v4297_v45 = vld [vmem:[%s4883_s14 + $0x78] sm:$0xff] }
 0x387   : > { %v2693_v13 = vmax.f32 %v2677_v18, 0.0  ;;  %v3881_v21 = vpop.f32.mrb[8].mxu1  ;;  %v2933_v18 = vrot.slane %v4287_v42, 1  ;;  %v2925_v46 = vrot.slane %v4297_v45, 1 }
 0x388   : > { %v3927_v50 = vadd.f32 %v3881_v21, %v3657_v43  ;;  %v2618_v41 = vpop.f32.mrb[9].mxu1  ;;  %v2707_v7 = vpack.c.bf16 %v2695_v12, %v2694_v26  ;;  %v5528_v26 = vsel %vm5820_vm2, %v2930_v38, %v2931_v54  ;;  %v4289_v21 = vld [vmem:[%s4883_s14 + $0xc8] sm:$0xff]  ;;  %v4298_v38 = vld [vmem:[%s4883_s14 + $0x80] sm:$0xff] }
 0x389   : > { %v3928_v22 = vadd.f32 %v2618_v41, %v1301_v63  ;;  %v3882_v37 = vpop.f32.mrb[10].mxu1  ;;  %v2706_v15 = vpack.c.bf16 %v2693_v13, %v2692_v1  ;;  %v5531_v12 = vsel %vm5821_vm15, %v2931_v54, %v2933_v18  ;;  %v4288_v1 = vld [vmem:[%s4883_s14 + $0xc0] sm:$0xff]  ;;  %v4290_v41 = vld [vmem:[%s4883_s14 + $0xd0] sm:$0xff]  ;;  %v2926_v33 = vrot.slane %v4298_v38, 1  ;;  %v4299_v18 = vld [vmem:[%s4883_s14 + $0x88] sm:$0xff] }
 0x38a   : > { %v2682_v14 = vadd.f32 %v3927_v50, %v5490_v3  ;;  %v3929_v5 = vadd.f32 %v3882_v37, %v3658_v44  ;;  %v2621_v23 = vpop.f32.mrb[11].mxu1  ;;  %v2940_v13 = vrot.slane %v4288_v1, 1  ;;  %v2941_v50 = vrot.slane %v4289_v21, 1 }
 0x38b   : > { %v2680_v27 = vadd.f32 %v3928_v22, %v5490_v3  ;;  %v3930_v4 = vadd.f32 %v2621_v23, %v1304_v55  ;;  %3907 = vmatprep.mubr.bf16.mxu0 %v2706_v15  ;;  %v4291_v15 = vld [vmem:[%s4883_s14 + $0x18] sm:$0xff]  ;;  %v2928_v1 = vrot.slane %v4299_v18, 1 }
 0x38c   : > { %v2683_v16 = vadd.f32 %v3929_v5, %v5490_v3  ;;  %3908 = vmatmul.mubr.bf16.gmra.mrb[80].mxu0 %v2707_v7  ;;  %v2698_v61 = vmax.f32 %v2682_v14, 0.0  ;;  %v2943_v7 = vrot.slane %v4290_v41, 1  ;;  %v5537_v22 = vsel %vm5822_vm0, %v2940_v13, %v2941_v50  ;;  %v4292_v5 = vld [vmem:[%s4883_s14 + $0x20] sm:$0xff] }
 0x38d   : > { %v2681_v24 = vadd.f32 %v3930_v4, %v5490_v3  ;;  %v2696_v39 = vmax.f32 %v2680_v27, 0.0  ;;  %v2905_v14 = vrot.slane %v4291_v15, 1  ;;  %v2906_v23 = vrot.slane %v4292_v5, 1  ;;  %v5548_v27 = vld [vmem:[%s5824_s1] ss:$0 sm:$0xff]  ;;  %v4293_v4 = vld [vmem:[%s4883_s14 + $0x28] sm:$0xff]  ;;  %s5836_s1 = smov %s5835_s25 }
 0x38e   : > { %v2699_v36 = vmax.f32 %v2683_v16, 0.0  ;;  %v5540_v37 = vsel %vm5823_vm12, %v2941_v50, %v2943_v7  ;;  %v2908_v16 = vrot.slane %v4293_v4, 1  ;;  %v2927_v41 = vsel %vm5829_vm10, %v2925_v46, %v2926_v33 }
 0x38f   : > { %v2697_v10 = vmax.f32 %v2681_v24, 0.0  ;;  %v3885_v43 = vpop.f32.mrb[12].mxu1  ;;  %v2929_v4 = vsel %vm5831_vm13, %v2926_v33, %v2928_v1 }
 0x390   : > { %v3931_v63 = vadd.f32 %v3885_v43, %v5479_v49  ;;  %v2634_v52 = vpop.f32.mrb[13].mxu1  ;;  %v2709_v9 = vpack.c.bf16 %v2699_v36, %v2698_v61 }
 0x391   : > { %v3932_v44 = vadd.f32 %v2634_v52, %v5481_v60  ;;  %v3886_v58 = vpop.f32.mrb[14].mxu1  ;;  %v2708_v62 = vpack.c.bf16 %v2697_v10, %v2696_v39  ;;  %v2907_v39 = vsel %vm5825_vm5, %v2905_v14, %v2906_v23 }
 0x392   : > { %v2686_v55 = vadd.f32 %v3931_v63, %v5490_v3  ;;  %v3933_v53 = vadd.f32 %v3886_v58, %v5483_v28  ;;  %v2637_v19 = vpop.f32.mrb[15].mxu1 }
 0x393   : > { %v2684_v0 = vadd.f32 %v3932_v44, %v5490_v3  ;;  %v3934_v32 = vadd.f32 %v2637_v19, %v5485_v34  ;;  %3911 = vmatprep.mubr.bf16.mxu0 %v2708_v62  ;;  %v2910_v34 = vrot.slane %v4279_v11, 1  ;;  %v2909_v44 = vsel %vm5826_vm7, %v2906_v23, %v2908_v16  ;;  %v4294_v19 = vld [vmem:[%s4883_s14 + $0x48] sm:$0xff] }
 0x394   : > { %v2687_v49 = vadd.f32 %v3933_v53, %v5490_v3  ;;  %3912 = vmatmul.mubr.bf16.gmra.mrb[84].mxu0 %v2709_v9  ;;  %v2702_v56 = vmax.f32 %v2686_v55, 0.0 }
 0x395   : > { %v2685_v60 = vadd.f32 %v3934_v32, %v5490_v3  ;;  %v2700_v59 = vmax.f32 %v2684_v0, 0.0  ;;  %v2913_v3 = vrot.slane %v4281_v20, 1  ;;  %v2912_v8 = vsel %vm5815_vm8, %v2910_v34, %v2911_v30  ;;  %v4295_v32 = vld [vmem:[%s4883_s14 + $0x50] sm:$0xff] }
 0x396   : > { %v2703_v2 = vmax.f32 %v2687_v49, 0.0  ;;  %v2915_v0 = vrot.slane %v4294_v19, 1  ;;  %v2916_v49 = vrot.slane %v4295_v32, 1 }
 0x397   : > { %v2701_v28 = vmax.f32 %v2685_v60, 0.0  ;;  %v2914_v57 = vsel %vm5816_vm4, %v2911_v30, %v2913_v3 }
 0x398   : > { %v2711_v6 = vpack.c.bf16 %v2703_v2, %v2702_v56  ;;  %v2917_v51 = vsel %vm5827_vm6, %v2915_v0, %v2916_v49 }
 0x399   : > { %v2710_v17 = vpack.c.bf16 %v2701_v28, %v2700_v59  ;;  %v4296_v59 = vld [vmem:[%s4883_s14 + $0x58] sm:$0xff] }
 0x39a   : > { %v2918_v28 = vrot.slane %v4296_v59, 1 }
 0x39b   : > { %3915 = vmatprep.mubr.bf16.mxu0 %v2710_v17 }
 0x39c   : > { %3916 = vmatmul.mubr.bf16.gmra.mrb[88].mxu0 %v2711_v6  ;;  %v2919_v25 = vsel %vm5828_vm14, %v2916_v49, %v2918_v28 }
 0x457   : > { %v3905_v24 = vpop.f32.mrb[76].mxu0 }
 0x458   : > { %v2826_v61 = vadd.f32 %v3905_v24, %v5548_v27  ;;  %v2817_v36 = vpop.f32.mrb[77].mxu0 }
 0x459   : > { %v2818_v10 = vadd.f32 %v5548_v27, %v2817_v36  ;;  %v3906_v43 = vpop.f32.mrb[78].mxu0 }
 0x45a   : > { %v2963_v63 = vadd.f32 %v2912_v8, %v2826_v61  ;;  %v2829_v52 = vadd.f32 %v3906_v43, %v5548_v27  ;;  %v2820_v9 = vpop.f32.mrb[79].mxu0  ;;  %v4301_v43 = vld [vmem:[%s4883_s14 + $0xb0] sm:$0xff] }
 0x45b   : > { %v2961_v58 = vadd.f32 %v2907_v39, %v2818_v10  ;;  %v2821_v62 = vadd.f32 %v5548_v27, %v2820_v9  ;;  %v4300_v39 = vld [vmem:[%s4883_s14 + $0xa8] sm:$0xff] }
 0x45c   : > { %v2979_v55 = vmax.f32 %v2963_v63, 0.0  ;;  %v2964_v53 = vadd.f32 %v2914_v57, %v2829_v52  ;;  %v2935_v10 = vrot.slane %v4300_v39, 1  ;;  %v2936_v63 = vrot.slane %v4301_v43, 1 }
 0x45d   : > { %v2977_v60 = vmax.f32 %v2961_v58, 0.0  ;;  %v2962_v56 = vadd.f32 %v2909_v44, %v2821_v62  ;;  %v4302_v44 = vld [vmem:[%s4883_s14 + $0xb8] sm:$0xff]  ;;  %s3026_s14 = sshll.u32 %s5561_s13, 4  ;;  %s5614_s14 = int_to_ptr.vmem [resolvable:$true] %s3026_s14 }
 0x45e   : > { %2995 = vst [vmem:[%s5561_s13 + $0x10] sm:$0xff] %v2979_v55  ;;  %v2980_v2 = vmax.f32 %v2964_v53, 0.0  ;;  %v2938_v58 = vrot.slane %v4302_v44, 1  ;;  %v2937_v19 = vsel %vm5832_vm11, %v2935_v10, %v2936_v63  ;;  %s4417_s8 = scalar_lea.vmem %s5614_s14, 2048  ;;  %p4424_p13 = scmp.lt.s32.totalorder %s5614_s14, %s4422_s18 }
 0x45f   : > { %2993 = vst [vmem:[%s5561_s13] sm:$0xff] %v2977_v60  ;;  %v2978_v6 = vmax.f32 %v2962_v56, 0.0  ;;  %v3909_v17 = vpop.f32.mrb[80].mxu0  ;;  %p4418_p10 = scmp.ne.s32.totalorder %s5614_s14, %s4417_s8  ;;  %p4425_p6 = scmp.lt.s32.totalorder %s4423_s20, %s4417_s8 }
 0x460   : > { %2996 = vst [vmem:[%s5561_s13 + $0x18] sm:$0xff] %v2980_v2  ;;  %v2842_v11 = vadd.f32 %v3909_v17, %v5548_v27  ;;  %v2833_v34 = vpop.f32.mrb[81].mxu0  ;;  %v2939_v2 = vsel %vm5833_vm9, %v2936_v63, %v2938_v58 }
 0x461   : > { %2994 = vst [vmem:[%s5561_s13 + $0x8] sm:$0xff] %v2978_v6  ;;  %v2834_v30 = vadd.f32 %v5548_v27, %v2833_v34  ;;  %v3910_v20 = vpop.f32.mrb[82].mxu0  ;;  %p4419_p9 = pnand %p4418_p10, %p5837_p2  ;;  %p4426_p8 = por %p4425_p6, %p4424_p13 }
 0x462   : > { %v2967_v3 = vadd.f32 %v2922_v31, %v2842_v11  ;;  %v2845_v8 = vadd.f32 %v3910_v20, %v5548_v27  ;;  %v2836_v57 = vpop.f32.mrb[83].mxu0 }
 0x463   : > { %v2965_v29 = vadd.f32 %v2917_v51, %v2834_v30  ;;  %v2837_v35 = vadd.f32 %v5548_v27, %v2836_v57  ;;  %p4420_p5 = pneg %p4419_p9 }
 0x464   : > { %v2983_v47 = vmax.f32 %v2967_v3, 0.0  ;;  %v2968_v48 = vadd.f32 %v5522_v40, %v2845_v8 }
 0x465   : > { %v2981_v31 = vmax.f32 %v2965_v29, 0.0  ;;  %v2966_v54 = vadd.f32 %v2919_v25, %v2837_v35  ;;  %p4427_p12 = pnand %p4426_p8, %p4420_p5 }
 0x466   : > { %2999 = vst [vmem:[%s5561_s13 + $0x30] sm:$0xff] %v2983_v47  ;;  %v2984_v42 = vmax.f32 %v2968_v48, 0.0 }
 0x467   : > { %2997 = vst [vmem:[%s5561_s13 + $0x20] sm:$0xff] %v2981_v31  ;;  %v2982_v13 = vmax.f32 %v2966_v54, 0.0  ;;  %v3913_v21 = vpop.f32.mrb[84].mxu0 }
 0x468   : > { %3000 = vst [vmem:[%s5561_s13 + $0x38] sm:$0xff] %v2984_v42  ;;  %v2858_v50 = vadd.f32 %v3913_v21, %v5548_v27  ;;  %v2849_v40 = vpop.f32.mrb[85].mxu0 }
 0x469   : > { %2998 = vst [vmem:[%s5561_s13 + $0x28] sm:$0xff] %v2982_v13  ;;  %v2850_v7 = vadd.f32 %v5548_v27, %v2849_v40  ;;  %v3914_v15 = vpop.f32.mrb[86].mxu0 }
 0x46a   : > { %v2971_v14 = vadd.f32 %v5528_v26, %v2858_v50  ;;  %v2861_v5 = vadd.f32 %v3914_v15, %v5548_v27  ;;  %v2852_v23 = vpop.f32.mrb[87].mxu0 }
 0x46b   : > { %v2969_v16 = vadd.f32 %v2927_v41, %v2850_v7  ;;  %v2853_v24 = vadd.f32 %v5548_v27, %v2852_v23 }
 0x46c   : > { %v2987_v61 = vmax.f32 %v2971_v14, 0.0  ;;  %v2972_v36 = vadd.f32 %v5531_v12, %v2861_v5 }
 0x46d   : > { %v2985_v26 = vmax.f32 %v2969_v16, 0.0  ;;  %v2970_v52 = vadd.f32 %v2929_v4, %v2853_v24 }
 0x46e   : > { %3003 = vst [vmem:[%s5561_s13 + $0x50] sm:$0xff] %v2987_v61  ;;  %v2988_v9 = vmax.f32 %v2972_v36, 0.0 }
 0x46f   : > { %3001 = vst [vmem:[%s5561_s13 + $0x40] sm:$0xff] %v2985_v26  ;;  %v2986_v62 = vmax.f32 %v2970_v52, 0.0  ;;  %v3917_v55 = vpop.f32.mrb[88].mxu0 }
 0x470   : > { %3004 = vst [vmem:[%s5561_s13 + $0x58] sm:$0xff] %v2988_v9  ;;  %v2874_v12 = vadd.f32 %v3917_v55, %v5548_v27  ;;  %v2865_v53 = vpop.f32.mrb[89].mxu0 }
 0x471   : > { %3002 = vst [vmem:[%s5561_s13 + $0x48] sm:$0xff] %v2986_v62  ;;  %v2866_v0 = vadd.f32 %v5548_v27, %v2865_v53  ;;  %v3918_v32 = vpop.f32.mrb[90].mxu0 }
 0x472   : > { %v2975_v49 = vadd.f32 %v5537_v22, %v2874_v12  ;;  %v2877_v60 = vadd.f32 %v3918_v32, %v5548_v27  ;;  %v2868_v56 = vpop.f32.mrb[91].mxu0 }
 0x473   : > { %v2973_v59 = vadd.f32 %v2937_v19, %v2866_v0  ;;  %v2869_v28 = vadd.f32 %v5548_v27, %v2868_v56 }
 0x474   : > { %v2991_v6 = vmax.f32 %v2975_v49, 0.0  ;;  %v2976_v17 = vadd.f32 %v5540_v37, %v2877_v60 }
 0x475   : > { %v2989_v11 = vmax.f32 %v2973_v59, 0.0  ;;  %v2974_v22 = vadd.f32 %v2939_v2, %v2869_v28 }
 0x476   : > { %3007 = vst [vmem:[%s5561_s13 + $0x70] sm:$0xff] %v2991_v6  ;;  %v2992_v34 = vmax.f32 %v2976_v17, 0.0 }
 0x477   : > { %3005 = vst [vmem:[%s5561_s13 + $0x60] sm:$0xff] %v2989_v11  ;;  %v2990_v27 = vmax.f32 %v2974_v22, 0.0 }
 0x478   : > { %3008 = vst [vmem:[%s5561_s13 + $0x78] sm:$0xff] %v2992_v34 }
 0x479   : > { %3006 = vst [vmem:[%s5561_s13 + $0x68] sm:$0xff] %v2990_v27 }
 0x47a   : > { %4430 = shalt.err (!%p4427_p12)
}
 0x47b   : > { %s4431_s12 = scalar_lea.hbm %s5612_s24, 2048  ;;  %s4435_s3 = scalar_lea.hbm %s5836_s1, 8192 }
 0x47c   : > { %p4432_p4 = scmp.ne.s32.totalorder %s5612_s24, %s4431_s12  ;;  %p4436_p0 = scmp.lt.u32.totalorder %s5612_s24, %s5836_s1 }
 0x47d   : > { %p4437_p1 = scmp.lt.u32.totalorder %s4435_s3, %s4431_s12  ;;  %p4439_p10 = scmp.lt.u32.totalorder %s4431_s12, %s5612_s24 }
 0x47e   : > { %p4433_p7 = pnand %p4432_p4, %p5837_p2 }
 0x47f   : > { %p4438_p11 = por %p4437_p1, %p4436_p0 }
 0x480   : > { %p4434_p3 = pneg %p4433_p7 }
 0x481   : > { %p4440_p9 = por %p4439_p10, %p4438_p11 }
 0x483   : > { %p4441_p5 = pnand %p4440_p9, %p4434_p3 }
 0x485   : > { %4444 = shalt.err (!%p4441_p5)
}
 0x486   : > { %s4560_s4 = smov 128   ;;  %s4561_s6 = smov 8  }
 0x487   : > { %4064 = dma.vmem_to_hbm [thread:$0]  (%p5837_p2), %s5614_s14, 2048, %s5612_s24, %s5621_s27, %s4560_s4, %s4560_s4, %s4561_s6  }
 0x488 PF: > { %s5838_s25 = sld [smem:[#allocation15_spill]]  ;;  %s5839_s8 = sld [smem:[#allocation19_spill]] }
 0x489   : > { %p4091_p13 = scmp.ge.s32.totalorder %s4547_s11, 2 }
 0x48e   : > { %s3041_s15 = sand.u32 1, %s5838_s25   ;;  %p5840_p6 = scmp.ne.s32.totalorder %s5839_s8, 0 }
 0x48f   : > { %s3042_s18 = scalar_lea.sflag [#allocation4], %s3041_s15 }
 0x490   : > { %p4081_p8 = pnand %p4091_p13, %p5840_p6 }
 0x492   : > { %4502 = dma.done.wait (!%p4081_p8), %s3042_s18, 2048  }
 0x493   : > { %4504 = vsyncadd (!%p4081_p8), %s3042_s18, 4294965248  ;;  %s25_s11 = sadd.s32 1, %s4547_s11   ;;  %s5841_s24 = sld [smem:[#allocation16_spill]] }
 0x494   : > { %p22_p12 = scmp.ge.s32.totalorder %s25_s11, 6   ;;  %s5842_s25 = smov %s4515_s26 }
 0x495   : > { %s5843_s26 = smov %s4809_s7  ;;  %s5844_s27 = smov %s4523_s28 }
 0x496   : > { %s5845_s28 = smov %s4527_s29  ;;  %s5846_s29 = smov %s4804_s23 }
 0x497   : > { %s5847_s30 = smov %s4539_s9  ;;  %s5848_s8 = smov %s4543_s10 }
 0x498   : > { %s5849_s9 = smov %s5852_s17  ;;  %s5850_s10 = smov %s5856_s22 }
 0x499   :  { %24 = sbr.rel (!%p22_p12) target bundleno = 17 (0x11), region = 114 }
 0x4a0   :  { %3047 = vsyncpa [#allocation3], 1 }
 0x4a1   :  { %3049 = vsyncpa [#allocation3 + $0x1], 1 }
 0x4a2   :  { %3050 = vsyncpa [#allocation6], 1 }
 0x4a3   :  { %3051 = vsyncpa [#allocation9], 1 }
 0x4a4   :  { %3052 = vsyncpa [#allocation4], 1 }
 0x4a5   :  { %3054 = vsyncpa [#allocation4 + $0x1], 1 }

</bundles_post_ra>
